<compile_context>
chip_gen: v7x
topology: tpu7x:2x2x1
jax: 0.10.0
libtpu: 0.0.40
codegen_flags: <defaults>
</compile_context>

<pallas_src>
import functools

import jax
import jax.numpy as jnp
from jax import lax
from jax.experimental import pallas as pl
from jax.experimental.pallas import tpu as pltpu


def _round_up(v, m):
    return (v + m - 1) // m * m


def _fused_gcn_kernel(a_ref, xw1_ref, w2_ref, g1_ref, be1_ref, g2_ref, be2_ref,
                      o_ref, *scratch, tm, inv_n, eps, a_resident):
    if a_resident:
        (a_vmem, a_sem, h1_ref, h2_ref, s1_ref, q1_ref, s2_ref, q2_ref) = scratch
    else:
        (h1_ref, h2_ref, s1_ref, q1_ref, s2_ref, q2_ref) = scratch
        a_vmem = a_sem = None

    p = pl.program_id(0)          # phase: 0 layer1, 1 BN1+ReLU, 2 layer2, 3 BN2+store
    i = pl.program_id(1)          # row tile
    row0 = pl.multiple_of(i * tm, tm)

    def a_tile():
        if a_resident:
            return a_vmem[pl.ds(row0, tm), :]
        return a_ref[...]

    @pl.when(jnp.logical_and(p == 0, i == 0))
    def _init():
        s1_ref[...] = jnp.zeros_like(s1_ref)
        q1_ref[...] = jnp.zeros_like(q1_ref)
        s2_ref[...] = jnp.zeros_like(s2_ref)
        q2_ref[...] = jnp.zeros_like(q2_ref)
        if a_resident:
            # One-time HBM -> VMEM load of the whole normalized adjacency.
            cp = pltpu.make_async_copy(a_ref, a_vmem, a_sem)
            cp.start()
            cp.wait()

    @pl.when(p == 0)
    def _layer1():
        # Layer 1: A_hat @ (X W1), f32 accumulation on the MXU.
        h = jnp.dot(a_tile(), xw1_ref[...], preferred_element_type=jnp.float32)
        h1_ref[pl.ds(row0, tm), :] = h.astype(jnp.bfloat16)
        s1_ref[...] += jnp.sum(h, axis=0, keepdims=True)
        q1_ref[...] += jnp.sum(h * h, axis=0, keepdims=True)

    @pl.when(p == 1)
    def _bn1_relu():
        @pl.when(i == 0)
        def _fold_bn1():
            # Fold BN1 into a single scale/shift, stored in the stat scratch.
            mean = s1_ref[...] * inv_n
            var = jnp.maximum(q1_ref[...] * inv_n - mean * mean, 0.0)
            scale = g1_ref[...] * lax.rsqrt(var + eps)
            s1_ref[...] = scale
            q1_ref[...] = be1_ref[...] - mean * scale

        h = h1_ref[pl.ds(row0, tm), :].astype(jnp.float32)
        h = jnp.maximum(h * s1_ref[...] + q1_ref[...], 0.0)      # BN1 + ReLU
        h1_ref[pl.ds(row0, tm), :] = h.astype(jnp.bfloat16)

    @pl.when(p == 2)
    def _layer2():
        # Layer 2: (A_hat @ H1n) @ W2.
        ah = jnp.dot(a_tile(), h1_ref[...], preferred_element_type=jnp.float32)
        h = jnp.dot(ah.astype(jnp.bfloat16), w2_ref[...],
                    preferred_element_type=jnp.float32)
        h2_ref[pl.ds(row0, tm), :] = h
        s2_ref[...] += jnp.sum(h, axis=0, keepdims=True)
        q2_ref[...] += jnp.sum(h * h, axis=0, keepdims=True)

    @pl.when(p == 3)
    def _bn2_store():
        @pl.when(i == 0)
        def _fold_bn2():
            mean = s2_ref[...] * inv_n
            var = jnp.maximum(q2_ref[...] * inv_n - mean * mean, 0.0)
            scale = g2_ref[...] * lax.rsqrt(var + eps)
            s2_ref[...] = scale
            q2_ref[...] = be2_ref[...] - mean * scale

        o_ref[...] = (h2_ref[pl.ds(row0, tm), :] * s2_ref[...] + q2_ref[...]
                      ).astype(o_ref.dtype)


def _vmem_capacity_bytes():
    try:
        info = pltpu.get_tpu_info()
        return int(getattr(info, "vmem_capacity_bytes", 64 * 1024 * 1024))
    except Exception:
        return 64 * 1024 * 1024


def gcn_encoder_pallas(a_p, xw1_p, w2_p, g1_p, be1_p, g2_p, be2_p, *, n, tm, eps=1e-5):
    n_pad = a_p.shape[0]
    hid_p = xw1_p.shape[1]
    out_p = w2_p.shape[1]
    nt = n_pad // tm

    vmem_cap = _vmem_capacity_bytes()

    # Pipelined blocks are double-buffered (x2); scratch buffers are single.
    fixed = (2 * n_pad * hid_p * 2              # X@W1 (bf16, 2 bufs)
             + 2 * hid_p * out_p * 2            # W2   (bf16, 2 bufs)
             + 2 * 2 * (hid_p + out_p) * 4      # BN gammas/betas (2 bufs)
             + 2 * tm * out_p * 4               # output tile (2 bufs)
             + n_pad * hid_p * 2                # H1 scratch (bf16)
             + n_pad * out_p * 4                # H2 scratch (f32)
             + 2 * (hid_p + out_p) * 4)         # BN stat accumulators
    a_res_bytes = n_pad * n_pad * 2             # resident A_hat scratch (1 buf)
    a_stream_bytes = 2 * tm * n_pad * 2         # streamed A row tiles (2 bufs)

    a_resident = (fixed + a_res_bytes) <= int(0.65 * vmem_cap)
    footprint = fixed + (a_res_bytes if a_resident else a_stream_bytes)
    vmem_limit = int(min(max(int(footprint * 1.25) + (2 << 20), 32 << 20),
                         int(0.9 * vmem_cap)))

    if a_resident:
        # Raw HBM ref; copied once into a VMEM scratch at the first grid step.
        a_spec = pl.BlockSpec(memory_space=pl.ANY)
        a_scratch = [pltpu.VMEM((n_pad, n_pad), jnp.bfloat16),
                     pltpu.SemaphoreType.DMA(())]
    else:
        # Stream row tiles; freeze the index during BN phases (no extra DMAs,
        # p==1 pre-fetches tile 0 for phase 2).
        a_spec = pl.BlockSpec(
            (tm, n_pad),
            lambda p, i: (jnp.where(p == 1, 0, jnp.where(p == 3, nt - 1, i)), 0))
        a_scratch = []

    kernel = functools.partial(_fused_gcn_kernel, tm=tm, inv_n=1.0 / float(n),
                               eps=eps, a_resident=a_resident)

    return pl.pallas_call(
        kernel,
        out_shape=jax.ShapeDtypeStruct((n_pad, out_p), jnp.float32),
        grid=(4, nt),
        in_specs=[
            a_spec,
            pl.BlockSpec((n_pad, hid_p), lambda p, i: (0, 0)),   # X @ W1 (resident)
            pl.BlockSpec((hid_p, out_p), lambda p, i: (0, 0)),   # W2 (resident)
            pl.BlockSpec((1, hid_p), lambda p, i: (0, 0)),       # BN1 gamma
            pl.BlockSpec((1, hid_p), lambda p, i: (0, 0)),       # BN1 beta
            pl.BlockSpec((1, out_p), lambda p, i: (0, 0)),       # BN2 gamma
            pl.BlockSpec((1, out_p), lambda p, i: (0, 0)),       # BN2 beta
        ],
        # Output tiles only advance during phase 3 -> no garbage writebacks.
        out_specs=pl.BlockSpec((tm, out_p),
                               lambda p, i: (jnp.where(p == 3, i, 0), 0)),
        scratch_shapes=a_scratch + [
            pltpu.VMEM((n_pad, hid_p), jnp.bfloat16),   # H1 (pre/post-BN, bf16)
            pltpu.VMEM((n_pad, out_p), jnp.float32),    # H2 (pre-BN, f32)
            pltpu.VMEM((1, hid_p), jnp.float32),        # sum(H1)   -> BN1 scale
            pltpu.VMEM((1, hid_p), jnp.float32),        # sum(H1^2) -> BN1 shift
            pltpu.VMEM((1, out_p), jnp.float32),        # sum(H2)   -> BN2 scale
            pltpu.VMEM((1, out_p), jnp.float32),        # sum(H2^2) -> BN2 shift
        ],
        compiler_params=pltpu.CompilerParams(
            dimension_semantics=("arbitrary", "arbitrary"),
            vmem_limit_bytes=vmem_limit),
    )(a_p, xw1_p, w2_p, g1_p, be1_p, g2_p, be2_p)


def _build_a_hat_padded(edge_index, n, n_pad):
    """D^-1/2 (A + I) D^-1/2 built directly into the padded bf16 buffer."""
    src, dst = edge_index[0], edge_index[1]
    adj = jnp.zeros((n_pad, n_pad), jnp.float32)
    adj = adj.at[dst, src].add(1.0)                    # messages src -> dst
    idx = jnp.arange(n)
    adj = adj.at[idx, idx].add(1.0)                    # self loops (real rows only)
    deg = jnp.sum(adj, axis=1)
    dinv = jnp.where(deg > 0, lax.rsqrt(deg), 0.0)
    return (dinv[:, None] * adj * dinv[None, :]).astype(jnp.bfloat16)


def normalized_adjacency(edge_index, num_nodes):
    """Dense D^-1/2 (A + I) D^-1/2 (f32, unpadded) for the reference check."""
    src, dst = edge_index[0], edge_index[1]
    adj = jnp.zeros((num_nodes, num_nodes), jnp.float32)
    adj = adj.at[dst, src].add(1.0)
    adj = adj + jnp.eye(num_nodes, dtype=jnp.float32)
    deg = jnp.sum(adj, axis=1)
    dinv = jnp.where(deg > 0, lax.rsqrt(deg), 0.0)
    return dinv[:, None] * adj * dinv[None, :]


@jax.jit
def _forward(x, edge_index, w1, g1, be1, w2, g2, be2):
    n, _ = x.shape
    hid = w1.shape[1]
    cout = w2.shape[1]

    hid_p = _round_up(hid, 128)
    out_p = _round_up(cout, 128)

    # Lane-dense row padding; single tile up to 256 rows, 256-row tiles beyond.
    n_pad = _round_up(n, 128)
    tm = n_pad if n_pad <= 256 else 256
    n_pad = _round_up(n_pad, tm)

    a_p = _build_a_hat_padded(edge_index, n, n_pad)

    # Hoist the tiny [N, cin] x [cin, hid] feature transform out of the kernel.
    xw1 = (x.astype(jnp.float32) @ w1).astype(jnp.bfloat16)
    xw1_p = jnp.zeros((n_pad, hid_p), jnp.bfloat16).at[:n, :hid].set(xw1)
    w2_p = jnp.zeros((hid_p, out_p), jnp.bfloat16).at[:hid, :cout].set(
        w2.astype(jnp.bfloat16))
    g1_p = jnp.zeros((1, hid_p), jnp.float32).at[:, :hid].set(g1)
    be1_p = jnp.zeros((1, hid_p), jnp.float32).at[:, :hid].set(be1)
    g2_p = jnp.zeros((1, out_p), jnp.float32).at[:, :cout].set(g2)
    be2_p = jnp.zeros((1, out_p), jnp.float32).at[:, :cout].set(be2)

    out_padded = gcn_encoder_pallas(a_p, xw1_p, w2_p, g1_p, be1_p, g2_p, be2_p,
                                    n=n, tm=tm)
    return out_padded[:n, :cout]


class GCNEncoderPallas:
    """Two-layer GCN encoder; parameters initialized deterministically."""

    def __init__(self, in_channels, out_channels, key):
        hidden = 2 * out_channels
        k1, k2 = jax.random.split(key)
        s1 = (6.0 / (in_channels + hidden)) ** 0.5
        s2 = (6.0 / (hidden + out_channels)) ** 0.5
        self.w1 = jax.random.uniform(k1, (in_channels, hidden), jnp.float32, -s1, s1)
        self.w2 = jax.random.uniform(k2, (hidden, out_channels), jnp.float32, -s2, s2)
        # GCNConv biases are zero-init and exactly cancelled by the following
        # BatchNorm mean subtraction -> folded out of the kernel.
        self.g1 = jnp.ones((1, hidden), jnp.float32)       # BatchNorm1 weight
        self.be1 = jnp.zeros((1, hidden), jnp.float32)     # BatchNorm1 bias
        self.g2 = jnp.ones((1, out_channels), jnp.float32)
        self.be2 = jnp.zeros((1, out_channels), jnp.float32)

    def __call__(self, x, edge_index):
        # dropout (eval path): identity
        return _forward(x, edge_index, self.w1, self.g1, self.be1,
                        self.w2, self.g2, self.be2)


def _reference(a_hat, x, w1, g1, be1, w2, g2, be2, eps=1e-5):
    """Pure-JAX f32 reference for a loose correctness check."""
    def bn(h, g, b):
        mean = jnp.mean(h, axis=0, keepdims=True)
        var = jnp.mean((h - mean) ** 2, axis=0, keepdims=True)
        return (h - mean) * lax.rsqrt(var + eps) * g + b

    h = bn(a_hat @ (x @ w1), g1, be1)
    h = jnp.maximum(h, 0.0)
    return bn(a_hat @ (h @ w2), g2, be2)


if __name__ == "__main__":
    key = jax.random.PRNGKey(0)
    k_x, k_e, k_p = jax.random.split(key, 3)

    num_nodes = 40
    in_channels = 4      # len(node_features[0]) in the reference
    out_channels = 128   # as in the reference module (hidden = 256)

    x = jax.random.normal(k_x, (num_nodes, in_channels), jnp.float32)

    num_edges = 120
    edge_index = jax.random.randint(k_e, (2, num_edges), 0, num_nodes, jnp.int32)

    model = GCNEncoderPallas(in_channels, out_channels, k_p)
    out = model(x, edge_index)
    jax.block_until_ready(out)

    assert out.shape == (num_nodes, out_channels)
    assert bool(jnp.all(jnp.isfinite(out)))

    # Loose check against the f32 reference (kernel matmuls run in bf16).
    a_hat = normalized_adjacency(edge_index, num_nodes)
    ref = _reference(a_hat, x, model.w1, model.g1, model.be1,
                     model.w2, model.g2, model.be2)
    err = jnp.abs(out - ref)
    assert float(jnp.mean(err)) < 0.05, f"mean err {float(jnp.mean(err))}"
    assert float(jnp.max(err)) < 0.5, f"max err {float(jnp.max(err))}"

    print("KERNEL_OK")
</pallas_src>

<mosaic_0001>
module attributes {stable_mosaic.version = 11 : i64} {
  func.func @_fused_gcn_kernel(%arg0: i32, %arg1: i32, %arg2: memref<128x128xbf16, #tpu.memory_space<any>>, %arg3: memref<128x256xbf16, #tpu.memory_space<vmem>>, %arg4: memref<256x128xbf16, #tpu.memory_space<vmem>>, %arg5: memref<1x256xf32, #tpu.memory_space<vmem>>, %arg6: memref<1x256xf32, #tpu.memory_space<vmem>>, %arg7: memref<1x128xf32, #tpu.memory_space<vmem>>, %arg8: memref<1x128xf32, #tpu.memory_space<vmem>>, %arg9: memref<128x128xf32, #tpu.memory_space<vmem>>, %arg10: memref<128x128xbf16, #tpu.memory_space<vmem>>, %arg11: memref<!tpu.dma_semaphore, #tpu.memory_space<semaphore_mem>>, %arg12: memref<128x256xbf16, #tpu.memory_space<vmem>>, %arg13: memref<128x128xf32, #tpu.memory_space<vmem>>, %arg14: memref<1x256xf32, #tpu.memory_space<vmem>>, %arg15: memref<1x256xf32, #tpu.memory_space<vmem>>, %arg16: memref<1x128xf32, #tpu.memory_space<vmem>>, %arg17: memref<1x128xf32, #tpu.memory_space<vmem>>) attributes {dimension_semantics = [#tpu.dimension_semantics<arbitrary>, #tpu.dimension_semantics<arbitrary>], iteration_bounds = array<i64: 4, 1>, scalar_prefetch = 0 : i64, scratch_operands = 8 : i64, tpu.core_type = #tpu.core_type<tc>, window_params = [{}, {pipeline_mode = #tpu.pipeline_mode<synchronous>, transform_indices = @transform_1, window_bounds = array<i64: 128, 256>}, {pipeline_mode = #tpu.pipeline_mode<synchronous>, transform_indices = @transform_2, window_bounds = array<i64: 256, 128>}, {pipeline_mode = #tpu.pipeline_mode<synchronous>, transform_indices = @transform_3, window_bounds = array<i64: 1, 256>}, {pipeline_mode = #tpu.pipeline_mode<synchronous>, transform_indices = @transform_4, window_bounds = array<i64: 1, 256>}, {pipeline_mode = #tpu.pipeline_mode<synchronous>, transform_indices = @transform_5, window_bounds = array<i64: 1, 128>}, {pipeline_mode = #tpu.pipeline_mode<synchronous>, transform_indices = @transform_6, window_bounds = array<i64: 1, 128>}, {transform_indices = @transform_7, window_bounds = array<i64: 128, 128>}]} {
    %c128_i32 = arith.constant 128 : i32
    %0 = arith.muli %arg1, %c128_i32 : i32
    %1 = tpu.assume_multiple %0, 128 : i32
    %c0_i32 = arith.constant 0 : i32
    %2 = arith.cmpi eq, %arg0, %c0_i32 : i32
    %c0_i32_0 = arith.constant 0 : i32
    %3 = arith.cmpi eq, %arg1, %c0_i32_0 : i32
    %4 = arith.andi %2, %3 : i1
    %5 = arith.extui %4 : i1 to i32
    %c0_i32_1 = arith.constant 0 : i32
    %6 = arith.cmpi ne, %5, %c0_i32_1 : i32
    scf.if %6 {
      %cst = arith.constant 0.000000e+00 : f32
      %19 = vector.broadcast %cst : f32 to vector<1x256xf32>
      %c0 = arith.constant 0 : index
      %c0_7 = arith.constant 0 : index
      %20 = vector.load %arg14[%c0, %c0_7] : memref<1x256xf32, #tpu.memory_space<vmem>>, vector<1x256xf32>
      tpu.vector_store %arg14[%c0, %c0_7], %19 {strides = array<i32>} : memref<1x256xf32, #tpu.memory_space<vmem>>, vector<1x256xf32>,
      %cst_8 = arith.constant 0.000000e+00 : f32
      %21 = vector.broadcast %cst_8 : f32 to vector<1x256xf32>
      %c0_9 = arith.constant 0 : index
      %c0_10 = arith.constant 0 : index
      %22 = vector.load %arg15[%c0_9, %c0_10] : memref<1x256xf32, #tpu.memory_space<vmem>>, vector<1x256xf32>
      tpu.vector_store %arg15[%c0_9, %c0_10], %21 {strides = array<i32>} : memref<1x256xf32, #tpu.memory_space<vmem>>, vector<1x256xf32>,
      %cst_11 = arith.constant 0.000000e+00 : f32
      %23 = vector.broadcast %cst_11 : f32 to vector<1x128xf32>
      %c0_12 = arith.constant 0 : index
      %c0_13 = arith.constant 0 : index
      %24 = vector.load %arg16[%c0_12, %c0_13] : memref<1x128xf32, #tpu.memory_space<vmem>>, vector<1x128xf32>
      tpu.vector_store %arg16[%c0_12, %c0_13], %23 {strides = array<i32>} : memref<1x128xf32, #tpu.memory_space<vmem>>, vector<1x128xf32>,
      %cst_14 = arith.constant 0.000000e+00 : f32
      %25 = vector.broadcast %cst_14 : f32 to vector<1x128xf32>
      %c0_15 = arith.constant 0 : index
      %c0_16 = arith.constant 0 : index
      %26 = vector.load %arg17[%c0_15, %c0_16] : memref<1x128xf32, #tpu.memory_space<vmem>>, vector<1x128xf32>
      tpu.vector_store %arg17[%c0_15, %c0_16], %25 {strides = array<i32>} : memref<1x128xf32, #tpu.memory_space<vmem>>, vector<1x128xf32>,
      tpu.enqueue_dma source(%arg2 : memref<128x128xbf16, #tpu.memory_space<any>>) target(%arg10 : memref<128x128xbf16, #tpu.memory_space<vmem>>) target_semaphore(%arg11 : memref<!tpu.dma_semaphore, #tpu.memory_space<semaphore_mem>>)
      tpu.wait_dma2 semaphore(%arg11 : memref<!tpu.dma_semaphore, #tpu.memory_space<semaphore_mem>>) src(%arg2 : memref<128x128xbf16, #tpu.memory_space<any>>) dst(%arg10 : memref<128x128xbf16, #tpu.memory_space<vmem>>)
    } else {
    }
    %c0_i32_2 = arith.constant 0 : i32
    %7 = arith.cmpi eq, %arg0, %c0_i32_2 : i32
    %8 = arith.extui %7 : i1 to i32
    %c0_i32_3 = arith.constant 0 : i32
    %9 = arith.cmpi ne, %8, %c0_i32_3 : i32
    scf.if %9 {
      %19 = arith.index_cast %1 : i32 to index
      %c0 = arith.constant 0 : index
      %20 = vector.load %arg10[%19, %c0] : memref<128x128xbf16, #tpu.memory_space<vmem>>, vector<128x128xbf16>
      %c0_7 = arith.constant 0 : index
      %c0_8 = arith.constant 0 : index
      %21 = vector.load %arg3[%c0_7, %c0_8] : memref<128x256xbf16, #tpu.memory_space<vmem>>, vector<128x256xbf16>
      %cst = arith.constant dense<0.000000e+00> : vector<128x256xf32>
      %22 = tpu.matmul %20, %21, %cst {dimension_numbers = #tpu.dot_dimension_numbers<[1], [0], [0], [1], [0, 0, 1, 1], [], []>} : vector<128x128xbf16>, vector<128x256xbf16>, vector<128x256xf32> -> vector<128x256xf32>
      %23 = arith.truncf %22 : vector<128x256xf32> to vector<128x256xbf16>
      %24 = arith.index_cast %1 : i32 to index
      %c0_9 = arith.constant 0 : index
      %25 = vector.load %arg12[%24, %c0_9] : memref<128x256xbf16, #tpu.memory_space<vmem>>, vector<128x256xbf16>
      tpu.vector_store %arg12[%24, %c0_9], %23 {strides = array<i32>} : memref<128x256xbf16, #tpu.memory_space<vmem>>, vector<128x256xbf16>,
      %c0_10 = arith.constant 0 : index
      %c0_11 = arith.constant 0 : index
      %26 = vector.load %arg14[%c0_10, %c0_11] : memref<1x256xf32, #tpu.memory_space<vmem>>, vector<1x256xf32>
      %cst_12 = arith.constant dense<0.000000e+00> : vector<256xf32>
      %27 = vector.multi_reduction <add>, %22, %cst_12 [0] : vector<128x256xf32> to vector<256xf32>
      %28 = vector.shape_cast %27 : vector<256xf32> to vector<1x256xf32>
      %29 = arith.addf %26, %28 : vector<1x256xf32>
      %c0_13 = arith.constant 0 : index
      %c0_14 = arith.constant 0 : index
      %30 = vector.load %arg14[%c0_13, %c0_14] : memref<1x256xf32, #tpu.memory_space<vmem>>, vector<1x256xf32>
      tpu.vector_store %arg14[%c0_13, %c0_14], %29 {strides = array<i32>} : memref<1x256xf32, #tpu.memory_space<vmem>>, vector<1x256xf32>,
      %c0_15 = arith.constant 0 : index
      %c0_16 = arith.constant 0 : index
      %31 = vector.load %arg15[%c0_15, %c0_16] : memref<1x256xf32, #tpu.memory_space<vmem>>, vector<1x256xf32>
      %32 = arith.mulf %22, %22 : vector<128x256xf32>
      %cst_17 = arith.constant dense<0.000000e+00> : vector<256xf32>
      %33 = vector.multi_reduction <add>, %32, %cst_17 [0] : vector<128x256xf32> to vector<256xf32>
      %34 = vector.shape_cast %33 : vector<256xf32> to vector<1x256xf32>
      %35 = arith.addf %31, %34 : vector<1x256xf32>
      %c0_18 = arith.constant 0 : index
      %c0_19 = arith.constant 0 : index
      %36 = vector.load %arg15[%c0_18, %c0_19] : memref<1x256xf32, #tpu.memory_space<vmem>>, vector<1x256xf32>
      tpu.vector_store %arg15[%c0_18, %c0_19], %35 {strides = array<i32>} : memref<1x256xf32, #tpu.memory_space<vmem>>, vector<1x256xf32>,
    } else {
    }
    %c1_i32 = arith.constant 1 : i32
    %10 = arith.cmpi eq, %arg0, %c1_i32 : i32
    %11 = arith.extui %10 : i1 to i32
    %c0_i32_4 = arith.constant 0 : i32
    %12 = arith.cmpi ne, %11, %c0_i32_4 : i32
    scf.if %12 {
      %c0_i32_7 = arith.constant 0 : i32
      %19 = arith.cmpi eq, %arg1, %c0_i32_7 : i32
      %20 = arith.extui %19 : i1 to i32
      %c0_i32_8 = arith.constant 0 : i32
      %21 = arith.cmpi ne, %20, %c0_i32_8 : i32
      scf.if %21 {
        %c0_14 = arith.constant 0 : index
        %c0_15 = arith.constant 0 : index
        %36 = vector.load %arg14[%c0_14, %c0_15] : memref<1x256xf32, #tpu.memory_space<vmem>>, vector<1x256xf32>
        %cst_16 = arith.constant 2.500000e-02 : f32
        %37 = vector.broadcast %cst_16 : f32 to vector<1x256xf32>
        %38 = arith.mulf %36, %37 : vector<1x256xf32>
        %c0_17 = arith.constant 0 : index
        %c0_18 = arith.constant 0 : index
        %39 = vector.load %arg15[%c0_17, %c0_18] : memref<1x256xf32, #tpu.memory_space<vmem>>, vector<1x256xf32>
        %cst_19 = arith.constant 2.500000e-02 : f32
        %40 = vector.broadcast %cst_19 : f32 to vector<1x256xf32>
        %41 = arith.mulf %39, %40 : vector<1x256xf32>
        %42 = arith.mulf %38, %38 : vector<1x256xf32>
        %43 = arith.subf %41, %42 : vector<1x256xf32>
        %cst_20 = arith.constant 0.000000e+00 : f32
        %44 = vector.broadcast %cst_20 : f32 to vector<1x256xf32>
        %45 = arith.maximumf %43, %44 : vector<1x256xf32>
        %c0_21 = arith.constant 0 : index
        %c0_22 = arith.constant 0 : index
        %46 = vector.load %arg5[%c0_21, %c0_22] : memref<1x256xf32, #tpu.memory_space<vmem>>, vector<1x256xf32>
        %cst_23 = arith.constant 9.99999974E-6 : f32
        %47 = vector.broadcast %cst_23 : f32 to vector<1x256xf32>
        %48 = arith.addf %45, %47 : vector<1x256xf32>
        %49 = math.rsqrt %48 : vector<1x256xf32>
        %50 = arith.mulf %46, %49 : vector<1x256xf32>
        %c0_24 = arith.constant 0 : index
        %c0_25 = arith.constant 0 : index
        %51 = vector.load %arg14[%c0_24, %c0_25] : memref<1x256xf32, #tpu.memory_space<vmem>>, vector<1x256xf32>
        tpu.vector_store %arg14[%c0_24, %c0_25], %50 {strides = array<i32>} : memref<1x256xf32, #tpu.memory_space<vmem>>, vector<1x256xf32>,
        %c0_26 = arith.constant 0 : index
        %c0_27 = arith.constant 0 : index
        %52 = vector.load %arg6[%c0_26, %c0_27] : memref<1x256xf32, #tpu.memory_space<vmem>>, vector<1x256xf32>
        %53 = arith.mulf %38, %50 : vector<1x256xf32>
        %54 = arith.subf %52, %53 : vector<1x256xf32>
        %c0_28 = arith.constant 0 : index
        %c0_29 = arith.constant 0 : index
        %55 = vector.load %arg15[%c0_28, %c0_29] : memref<1x256xf32, #tpu.memory_space<vmem>>, vector<1x256xf32>
        tpu.vector_store %arg15[%c0_28, %c0_29], %54 {strides = array<i32>} : memref<1x256xf32, #tpu.memory_space<vmem>>, vector<1x256xf32>,
      } else {
      }
      %22 = arith.index_cast %1 : i32 to index
      %c0 = arith.constant 0 : index
      %23 = vector.load %arg12[%22, %c0] : memref<128x256xbf16, #tpu.memory_space<vmem>>, vector<128x256xbf16>
      %24 = arith.extf %23 : vector<128x256xbf16> to vector<128x256xf32>
      %c0_9 = arith.constant 0 : index
      %c0_10 = arith.constant 0 : index
      %25 = vector.load %arg14[%c0_9, %c0_10] : memref<1x256xf32, #tpu.memory_space<vmem>>, vector<1x256xf32>
      %26 = vector.broadcast %25 : vector<1x256xf32> to vector<128x256xf32>
      %27 = arith.mulf %24, %26 : vector<128x256xf32>
      %c0_11 = arith.constant 0 : index
      %c0_12 = arith.constant 0 : index
      %28 = vector.load %arg15[%c0_11, %c0_12] : memref<1x256xf32, #tpu.memory_space<vmem>>, vector<1x256xf32>
      %29 = vector.broadcast %28 : vector<1x256xf32> to vector<128x256xf32>
      %30 = arith.addf %27, %29 : vector<128x256xf32>
      %cst = arith.constant 0.000000e+00 : f32
      %31 = vector.broadcast %cst : f32 to vector<128x256xf32>
      %32 = arith.maximumf %30, %31 : vector<128x256xf32>
      %33 = arith.truncf %32 : vector<128x256xf32> to vector<128x256xbf16>
      %34 = arith.index_cast %1 : i32 to index
      %c0_13 = arith.constant 0 : index
      %35 = vector.load %arg12[%34, %c0_13] : memref<128x256xbf16, #tpu.memory_space<vmem>>, vector<128x256xbf16>
      tpu.vector_store %arg12[%34, %c0_13], %33 {strides = array<i32>} : memref<128x256xbf16, #tpu.memory_space<vmem>>, vector<128x256xbf16>,
    } else {
    }
    %c2_i32 = arith.constant 2 : i32
    %13 = arith.cmpi eq, %arg0, %c2_i32 : i32
    %14 = arith.extui %13 : i1 to i32
    %c0_i32_5 = arith.constant 0 : i32
    %15 = arith.cmpi ne, %14, %c0_i32_5 : i32
    scf.if %15 {
      %19 = arith.index_cast %1 : i32 to index
      %c0 = arith.constant 0 : index
      %20 = vector.load %arg10[%19, %c0] : memref<128x128xbf16, #tpu.memory_space<vmem>>, vector<128x128xbf16>
      %c0_7 = arith.constant 0 : index
      %c0_8 = arith.constant 0 : index
      %21 = vector.load %arg12[%c0_7, %c0_8] : memref<128x256xbf16, #tpu.memory_space<vmem>>, vector<128x256xbf16>
      %cst = arith.constant dense<0.000000e+00> : vector<128x256xf32>
      %22 = tpu.matmul %20, %21, %cst {dimension_numbers = #tpu.dot_dimension_numbers<[1], [0], [0], [1], [0, 0, 1, 1], [], []>} : vector<128x128xbf16>, vector<128x256xbf16>, vector<128x256xf32> -> vector<128x256xf32>
      %23 = arith.truncf %22 : vector<128x256xf32> to vector<128x256xbf16>
      %c0_9 = arith.constant 0 : index
      %c0_10 = arith.constant 0 : index
      %24 = vector.load %arg4[%c0_9, %c0_10] : memref<256x128xbf16, #tpu.memory_space<vmem>>, vector<256x128xbf16>
      %cst_11 = arith.constant dense<0.000000e+00> : vector<128x128xf32>
      %25 = tpu.matmul %23, %24, %cst_11 {dimension_numbers = #tpu.dot_dimension_numbers<[1], [0], [0], [1], [0, 0, 1, 1], [], []>} : vector<128x256xbf16>, vector<256x128xbf16>, vector<128x128xf32> -> vector<128x128xf32>
      %26 = arith.index_cast %1 : i32 to index
      %c0_12 = arith.constant 0 : index
      %27 = vector.load %arg13[%26, %c0_12] : memref<128x128xf32, #tpu.memory_space<vmem>>, vector<128x128xf32>
      tpu.vector_store %arg13[%26, %c0_12], %25 {strides = array<i32>} : memref<128x128xf32, #tpu.memory_space<vmem>>, vector<128x128xf32>,
      %c0_13 = arith.constant 0 : index
      %c0_14 = arith.constant 0 : index
      %28 = vector.load %arg16[%c0_13, %c0_14] : memref<1x128xf32, #tpu.memory_space<vmem>>, vector<1x128xf32>
      %cst_15 = arith.constant dense<0.000000e+00> : vector<128xf32>
      %29 = vector.multi_reduction <add>, %25, %cst_15 [0] : vector<128x128xf32> to vector<128xf32>
      %30 = vector.shape_cast %29 : vector<128xf32> to vector<1x128xf32>
      %31 = arith.addf %28, %30 : vector<1x128xf32>
      %c0_16 = arith.constant 0 : index
      %c0_17 = arith.constant 0 : index
      %32 = vector.load %arg16[%c0_16, %c0_17] : memref<1x128xf32, #tpu.memory_space<vmem>>, vector<1x128xf32>
      tpu.vector_store %arg16[%c0_16, %c0_17], %31 {strides = array<i32>} : memref<1x128xf32, #tpu.memory_space<vmem>>, vector<1x128xf32>,
      %c0_18 = arith.constant 0 : index
      %c0_19 = arith.constant 0 : index
      %33 = vector.load %arg17[%c0_18, %c0_19] : memref<1x128xf32, #tpu.memory_space<vmem>>, vector<1x128xf32>
      %34 = arith.mulf %25, %25 : vector<128x128xf32>
      %cst_20 = arith.constant dense<0.000000e+00> : vector<128xf32>
      %35 = vector.multi_reduction <add>, %34, %cst_20 [0] : vector<128x128xf32> to vector<128xf32>
      %36 = vector.shape_cast %35 : vector<128xf32> to vector<1x128xf32>
      %37 = arith.addf %33, %36 : vector<1x128xf32>
      %c0_21 = arith.constant 0 : index
      %c0_22 = arith.constant 0 : index
      %38 = vector.load %arg17[%c0_21, %c0_22] : memref<1x128xf32, #tpu.memory_space<vmem>>, vector<1x128xf32>
      tpu.vector_store %arg17[%c0_21, %c0_22], %37 {strides = array<i32>} : memref<1x128xf32, #tpu.memory_space<vmem>>, vector<1x128xf32>,
    } else {
    }
    %c3_i32 = arith.constant 3 : i32
    %16 = arith.cmpi eq, %arg0, %c3_i32 : i32
    %17 = arith.extui %16 : i1 to i32
    %c0_i32_6 = arith.constant 0 : i32
    %18 = arith.cmpi ne, %17, %c0_i32_6 : i32
    scf.if %18 {
      %c0_i32_7 = arith.constant 0 : i32
      %19 = arith.cmpi eq, %arg1, %c0_i32_7 : i32
      %20 = arith.extui %19 : i1 to i32
      %c0_i32_8 = arith.constant 0 : i32
      %21 = arith.cmpi ne, %20, %c0_i32_8 : i32
      scf.if %21 {
        %c0_15 = arith.constant 0 : index
        %c0_16 = arith.constant 0 : index
        %31 = vector.load %arg16[%c0_15, %c0_16] : memref<1x128xf32, #tpu.memory_space<vmem>>, vector<1x128xf32>
        %cst = arith.constant 2.500000e-02 : f32
        %32 = vector.broadcast %cst : f32 to vector<1x128xf32>
        %33 = arith.mulf %31, %32 : vector<1x128xf32>
        %c0_17 = arith.constant 0 : index
        %c0_18 = arith.constant 0 : index
        %34 = vector.load %arg17[%c0_17, %c0_18] : memref<1x128xf32, #tpu.memory_space<vmem>>, vector<1x128xf32>
        %cst_19 = arith.constant 2.500000e-02 : f32
        %35 = vector.broadcast %cst_19 : f32 to vector<1x128xf32>
        %36 = arith.mulf %34, %35 : vector<1x128xf32>
        %37 = arith.mulf %33, %33 : vector<1x128xf32>
        %38 = arith.subf %36, %37 : vector<1x128xf32>
        %cst_20 = arith.constant 0.000000e+00 : f32
        %39 = vector.broadcast %cst_20 : f32 to vector<1x128xf32>
        %40 = arith.maximumf %38, %39 : vector<1x128xf32>
        %c0_21 = arith.constant 0 : index
        %c0_22 = arith.constant 0 : index
        %41 = vector.load %arg7[%c0_21, %c0_22] : memref<1x128xf32, #tpu.memory_space<vmem>>, vector<1x128xf32>
        %cst_23 = arith.constant 9.99999974E-6 : f32
        %42 = vector.broadcast %cst_23 : f32 to vector<1x128xf32>
        %43 = arith.addf %40, %42 : vector<1x128xf32>
        %44 = math.rsqrt %43 : vector<1x128xf32>
        %45 = arith.mulf %41, %44 : vector<1x128xf32>
        %c0_24 = arith.constant 0 : index
        %c0_25 = arith.constant 0 : index
        %46 = vector.load %arg16[%c0_24, %c0_25] : memref<1x128xf32, #tpu.memory_space<vmem>>, vector<1x128xf32>
        tpu.vector_store %arg16[%c0_24, %c0_25], %45 {strides = array<i32>} : memref<1x128xf32, #tpu.memory_space<vmem>>, vector<1x128xf32>,
        %c0_26 = arith.constant 0 : index
        %c0_27 = arith.constant 0 : index
        %47 = vector.load %arg8[%c0_26, %c0_27] : memref<1x128xf32, #tpu.memory_space<vmem>>, vector<1x128xf32>
        %48 = arith.mulf %33, %45 : vector<1x128xf32>
        %49 = arith.subf %47, %48 : vector<1x128xf32>
        %c0_28 = arith.constant 0 : index
        %c0_29 = arith.constant 0 : index
        %50 = vector.load %arg17[%c0_28, %c0_29] : memref<1x128xf32, #tpu.memory_space<vmem>>, vector<1x128xf32>
        tpu.vector_store %arg17[%c0_28, %c0_29], %49 {strides = array<i32>} : memref<1x128xf32, #tpu.memory_space<vmem>>, vector<1x128xf32>,
      } else {
      }
      %22 = arith.index_cast %1 : i32 to index
      %c0 = arith.constant 0 : index
      %23 = vector.load %arg13[%22, %c0] : memref<128x128xf32, #tpu.memory_space<vmem>>, vector<128x128xf32>
      %c0_9 = arith.constant 0 : index
      %c0_10 = arith.constant 0 : index
      %24 = vector.load %arg16[%c0_9, %c0_10] : memref<1x128xf32, #tpu.memory_space<vmem>>, vector<1x128xf32>
      %25 = vector.broadcast %24 : vector<1x128xf32> to vector<128x128xf32>
      %26 = arith.mulf %23, %25 : vector<128x128xf32>
      %c0_11 = arith.constant 0 : index
      %c0_12 = arith.constant 0 : index
      %27 = vector.load %arg17[%c0_11, %c0_12] : memref<1x128xf32, #tpu.memory_space<vmem>>, vector<1x128xf32>
      %28 = vector.broadcast %27 : vector<1x128xf32> to vector<128x128xf32>
      %29 = arith.addf %26, %28 : vector<128x128xf32>
      %c0_13 = arith.constant 0 : index
      %c0_14 = arith.constant 0 : index
      %30 = vector.load %arg9[%c0_13, %c0_14] : memref<128x128xf32, #tpu.memory_space<vmem>>, vector<128x128xf32>
      tpu.vector_store %arg9[%c0_13, %c0_14], %29 {strides = array<i32>} : memref<128x128xf32, #tpu.memory_space<vmem>>, vector<128x128xf32>,
    } else {
    }
    return
  }
  func.func @transform_1(%arg0: i32, %arg1: i32) -> (i32, i32) {
    %c0_i32 = arith.constant 0 : i32
    %c0_i32_0 = arith.constant 0 : i32
    %c0_i32_1 = arith.constant 0 : i32
    return %c0_i32, %c0_i32_0 : i32, i32
  }
  func.func @transform_2(%arg0: i32, %arg1: i32) -> (i32, i32) {
    %c0_i32 = arith.constant 0 : i32
    %c0_i32_0 = arith.constant 0 : i32
    %c0_i32_1 = arith.constant 0 : i32
    return %c0_i32, %c0_i32_0 : i32, i32
  }
  func.func @transform_3(%arg0: i32, %arg1: i32) -> (i32, i32) {
    %c0_i32 = arith.constant 0 : i32
    %c0_i32_0 = arith.constant 0 : i32
    %c0_i32_1 = arith.constant 0 : i32
    return %c0_i32, %c0_i32_0 : i32, i32
  }
  func.func @transform_4(%arg0: i32, %arg1: i32) -> (i32, i32) {
    %c0_i32 = arith.constant 0 : i32
    %c0_i32_0 = arith.constant 0 : i32
    %c0_i32_1 = arith.constant 0 : i32
    return %c0_i32, %c0_i32_0 : i32, i32
  }
  func.func @transform_5(%arg0: i32, %arg1: i32) -> (i32, i32) {
    %c0_i32 = arith.constant 0 : i32
    %c0_i32_0 = arith.constant 0 : i32
    %c0_i32_1 = arith.constant 0 : i32
    return %c0_i32, %c0_i32_0 : i32, i32
  }
  func.func @transform_6(%arg0: i32, %arg1: i32) -> (i32, i32) {
    %c0_i32 = arith.constant 0 : i32
    %c0_i32_0 = arith.constant 0 : i32
    %c0_i32_1 = arith.constant 0 : i32
    return %c0_i32, %c0_i32_0 : i32, i32
  }
  func.func @transform_7(%arg0: i32, %arg1: i32) -> (i32, i32) {
    %c3_i32 = arith.constant 3 : i32
    %0 = arith.cmpi eq, %arg0, %c3_i32 : i32
    %c0_i32 = arith.constant 0 : i32
    %1 = arith.select %0, %arg1, %c0_i32 : i32
    %c0_i32_0 = arith.constant 0 : i32
    %c0_i32_1 = arith.constant 0 : i32
    return %1, %c0_i32_0 : i32, i32
  }
}

</mosaic_0001>

<bundles_post_ra>
// kernel: _forward.1
= control target key start
LH: loop header
LB: loop body
LE: loop exit
PB: predicated region body
PF: predicated region fallthrough
CT: control target
= control target key end

     0   :  { %s1910_s24 = smov 0   ;;  %s1912_s25 = smov 0   ;;  %s2378_s0 = inlined_call_operand.vmem [shape: bf16[128,128], index: 0, kind: input, shape index: {}]   ;;  %s2379_s1 = inlined_call_operand.vmem [shape: bf16[128,256], index: 1, kind: input, shape index: {}]   ;;  %s2380_s2 = inlined_call_operand.vmem [shape: bf16[256,128], index: 2, kind: input, shape index: {}]   ;;  %s2381_s3 = inlined_call_operand.vmem [shape: f32[1,256], index: 3, kind: input, shape index: {}]   ;;  %s2382_s4 = inlined_call_operand.vmem [shape: f32[1,256], index: 4, kind: input, shape index: {}]   ;;  %s2383_s5 = inlined_call_operand.vmem [shape: f32[1,128], index: 5, kind: input, shape index: {}]   ;;  %s2384_s6 = inlined_call_operand.vmem [shape: f32[1,128], index: 6, kind: input, shape index: {}]   ;;  %s2385_s7 = inlined_call_operand.vmem [shape: f32[128,128], index: 7, kind: output, shape index: {}]  }
   0x1   :  { %s1914_s26 = smov 0  }
   0x2 LB: > { %s29_s27 = sadd.s32 1, %s1860_s25  ;;  %p1642_p0 = scmp.ge.s32.totalorder %s1864_s26, 1  ;;  %s1864_s26 = sphi %s1914_s26, %s17_s26   ;;  %s1860_s25 = sphi %s1912_s25, %s2389_s25   ;;  %s1856_s24 = sphi %s1910_s24, %s2388_s24  }
   0x3   : > { %p31_p1 = scmp.ge.s32.totalorder %s29_s27, 4  ;;  %p219_p2 = scmp.lt.s32.totalorder %s1864_s26, 5 }
   0x5   : > { %s2391_s27 = smov (%p31_p1, %s29_s27), 0  ;;  %p220_p3 = pnand %p1642_p0, %p219_p2 }
   0x6   : > { %p258_p4 = scmp.eq.s32.totalorder (!%p220_p3), %s1856_s24, 0 }
   0x7   : > { %223 = sbr.rel (%p220_p3) target bundleno = 1005 (0x3ed), region = 44 }
   0xe   : > { %263 = sbr.rel (!%p258_p4) target bundleno = 24 (0x18), region = 48  ;;  %v264_v0 = vlaneseq (%p258_p4)  ;;  %v304_v1 = vld [vmem:[%s2378_s0] sm:$0xff] (%p258_p4)  ;;  %v306_v2 = vld [vmem:[%s2378_s0 + $0x8] sm:$0xff] (%p258_p4)  ;;  %v308_v3 = vld [vmem:[%s2378_s0 + $0x10] sm:$0xff] (%p258_p4)  ;;  %v1866_v4 = vmov (%p258_p4), 0.0  }
   0xf   : > { %270 = vst [vmem:[#allocation8] sm:$0x1] (%p258_p4), %v1866_v4  ;;  %271 = vst [vmem:[#allocation9] sm:$0x1] (%p258_p4), %v1866_v4  ;;  %v310_v5 = vld [vmem:[%s2378_s0 + $0x18] sm:$0xff] (%p258_p4)  ;;  %v312_v6 = vld [vmem:[%s2378_s0 + $0x20] sm:$0xff] (%p258_p4) }
  0x10   : > { %305 = vst [vmem:[#allocation2] sm:$0xff] (%p258_p4), %v304_v1  ;;  %307 = vst [vmem:[#allocation2 + $0x8] sm:$0xff] (%p258_p4), %v306_v2  ;;  %v314_v7 = vld [vmem:[%s2378_s0 + $0x28] sm:$0xff] (%p258_p4)  ;;  %vm266_vm0 = vcmp.lt.s32.totalorder (%p258_p4), %v264_v0, 256  ;;  %v316_v8 = vld [vmem:[%s2378_s0 + $0x30] sm:$0xff] (%p258_p4) }
  0x11   : > { %309 = vst [vmem:[#allocation2 + $0x10] sm:$0xff] (%p258_p4), %v308_v3  ;;  %311 = vst [vmem:[#allocation2 + $0x18] sm:$0xff] (%p258_p4), %v310_v5  ;;  %v318_v9 = vld [vmem:[%s2378_s0 + $0x38] sm:$0xff] (%p258_p4) }
  0x12   : > { %313 = vst [vmem:[#allocation2 + $0x20] sm:$0xff] (%p258_p4), %v312_v6  ;;  %315 = vst [vmem:[#allocation2 + $0x28] sm:$0xff] (%p258_p4), %v314_v7 }
  0x13   : > { %268 = vst.msk [vmem:[#allocation6] sm:$0x3] (%p258_p4), %vm266_vm0, %v1866_v4  ;;  %269 = vst.msk [vmem:[#allocation7] sm:$0x3] (%p258_p4), %vm266_vm0, %v1866_v4 }
  0x14   : > { %317 = vst [vmem:[#allocation2 + $0x30] sm:$0xff] (%p258_p4), %v316_v8  ;;  %319 = vst [vmem:[#allocation2 + $0x38] sm:$0xff] (%p258_p4), %v318_v9 }
  0x15   : > { %327 = vsyncadd [#allocation3], 1024 }
  0x16   : > { %1852 = dma.done.wait [#allocation3], 1024 }
  0x17   : > { %1853 = vsyncadd [#allocation3], 4294966272 }
  0x18 PF: > { %p1644_p5 = scmp.ne.s32.totalorder %s1856_s24, 0 }
  0x19   : > { %v1796_v10 = vld [vmem:[%s2379_s1 + $0x4] ss:$8 sps:$4 sm:$0xff] (!%p1644_p5)   ;;  %v1798_v11 = vld [vmem:[%s2379_s1] ss:$8 sps:$4 sm:$0xff] (!%p1644_p5)   ;;  %v1867_v12 = vmov (!%p1644_p5), 0  }
  0x1a   : > { %334 = sbr.rel (%p1644_p5) target bundleno = 339 (0x153), region = 86  ;;  %475 = vmatprep.mubr.bf16.mxu0 (!%p1644_p5), %v1867_v12  ;;  %515 = vmatprep.mubr.bf16.mxu1 (!%p1644_p5), %v1867_v12  ;;  %v1799_v13 = vld [vmem:[%s2379_s1 + $0x14] ss:$8 sps:$4 sm:$0xff] (!%p1644_p5)   ;;  %v1801_v14 = vld [vmem:[%s2379_s1 + $0x10] ss:$8 sps:$4 sm:$0xff] (!%p1644_p5)   ;;  %v339_v27 = vld [vmem:[#allocation2] sm:$0xff] (!%p1644_p5) }
  0x1b   : > { %443 = vmatprep.subr.bf16.mxu0 (!%p1644_p5), %v1796_v10  ;;  %1752 = vmatprep.subr.bf16.mxu1 (!%p1644_p5), %v1796_v10  ;;  %v1802_v15 = vld [vmem:[%s2379_s1 + $0x24] ss:$8 sps:$4 sm:$0xff] (!%p1644_p5)   ;;  %v1804_v16 = vld [vmem:[%s2379_s1 + $0x20] ss:$8 sps:$4 sm:$0xff] (!%p1644_p5)   ;;  %v1805_v17 = vld [vmem:[%s2379_s1 + $0x34] ss:$8 sps:$4 sm:$0xff] (!%p1644_p5)  }
  0x1c   : > { %444 = vmatpush1.bf16.msra.mxu0 (!%p1644_p5), %v1798_v11  ;;  %1760 = vmatpush1.bf16.msra.mxu1 (!%p1644_p5), %v1798_v11  ;;  %v1807_v18 = vld [vmem:[%s2379_s1 + $0x30] ss:$8 sps:$4 sm:$0xff] (!%p1644_p5)   ;;  %v1808_v19 = vld [vmem:[%s2379_s1 + $0x44] ss:$8 sps:$4 sm:$0xff] (!%p1644_p5)   ;;  %v1810_v20 = vld [vmem:[%s2379_s1 + $0x40] ss:$8 sps:$4 sm:$0xff] (!%p1644_p5)  }
  0x1d   : > { %445 = vmatprep.subr.bf16.mxu0 (!%p1644_p5), %v1799_v13  ;;  %1753 = vmatprep.subr.bf16.mxu1 (!%p1644_p5), %v1799_v13  ;;  %v1811_v21 = vld [vmem:[%s2379_s1 + $0x54] ss:$8 sps:$4 sm:$0xff] (!%p1644_p5)   ;;  %v1813_v22 = vld [vmem:[%s2379_s1 + $0x50] ss:$8 sps:$4 sm:$0xff] (!%p1644_p5)   ;;  %v1814_v23 = vld [vmem:[%s2379_s1 + $0x64] ss:$8 sps:$4 sm:$0xff] (!%p1644_p5)  }
  0x1e   : > { %v1816_v24 = vld [vmem:[%s2379_s1 + $0x60] ss:$8 sps:$4 sm:$0xff] (!%p1644_p5)   ;;  %v1817_v25 = vld [vmem:[%s2379_s1 + $0x74] ss:$8 sps:$4 sm:$0xff] (!%p1644_p5)   ;;  %v1819_v26 = vld [vmem:[%s2379_s1 + $0x70] ss:$8 sps:$4 sm:$0xff] (!%p1644_p5)  }
  0x1f   : > { %v343_v28 = vld [vmem:[#allocation2 + $0x20] sm:$0xff] (!%p1644_p5)  ;;  %v340_v29 = vld [vmem:[#allocation2 + $0x8] sm:$0xff] (!%p1644_p5)  ;;  %v341_v31 = vld [vmem:[#allocation2 + $0x10] sm:$0xff] (!%p1644_p5) }
  0x20   : > { %446 = vmatpush1.bf16.msra.mxu0 (!%p1644_p5), %v1801_v14  ;;  %1761 = vmatpush1.bf16.msra.mxu1 (!%p1644_p5), %v1801_v14  ;;  %v344_v30 = vld [vmem:[#allocation2 + $0x28] sm:$0xff] (!%p1644_p5)  ;;  %v345_v32 = vld [vmem:[#allocation2 + $0x30] sm:$0xff] (!%p1644_p5)  ;;  %v342_v33 = vld [vmem:[#allocation2 + $0x18] sm:$0xff] (!%p1644_p5) }
  0x21   : > { %447 = vmatprep.subr.bf16.mxu0 %v1802_v15  ;;  %1754 = vmatprep.subr.bf16.mxu1 %v1802_v15  ;;  %v346_v34 = vld [vmem:[#allocation2 + $0x38] sm:$0xff] }
  0x24   : > { %448 = vmatpush1.bf16.msra.mxu0 %v1804_v16  ;;  %1762 = vmatpush1.bf16.msra.mxu1 %v1804_v16 }
  0x25   : > { %449 = vmatprep.subr.bf16.mxu0 %v1805_v17  ;;  %1755 = vmatprep.subr.bf16.mxu1 %v1805_v17 }
  0x28   : > { %450 = vmatpush1.bf16.msra.mxu0 %v1807_v18  ;;  %1763 = vmatpush1.bf16.msra.mxu1 %v1807_v18 }
  0x29   : > { %451 = vmatprep.subr.bf16.mxu0 %v1808_v19  ;;  %1756 = vmatprep.subr.bf16.mxu1 %v1808_v19 }
  0x2c   : > { %452 = vmatpush1.bf16.msra.mxu0 %v1810_v20  ;;  %1764 = vmatpush1.bf16.msra.mxu1 %v1810_v20 }
  0x2d   : > { %453 = vmatprep.subr.bf16.mxu0 %v1811_v21  ;;  %1757 = vmatprep.subr.bf16.mxu1 %v1811_v21 }
  0x30   : > { %454 = vmatpush1.bf16.msra.mxu0 %v1813_v22  ;;  %1765 = vmatpush1.bf16.msra.mxu1 %v1813_v22 }
  0x31   : > { %455 = vmatprep.subr.bf16.mxu0 %v1814_v23  ;;  %1758 = vmatprep.subr.bf16.mxu1 %v1814_v23 }
  0x34   : > { %456 = vmatpush1.bf16.msra.mxu0 %v1816_v24  ;;  %1766 = vmatpush1.bf16.msra.mxu1 %v1816_v24 }
  0x35   : > { %457 = vmatprep.subr.bf16.mxu0 %v1817_v25  ;;  %1759 = vmatprep.subr.bf16.mxu1 %v1817_v25 }
  0x38   : > { %458 = vmatpush1.bf16.msra.mxu0 %v1819_v26  ;;  %1767 = vmatpush1.bf16.msra.mxu1 %v1819_v26 }
  0x3b   : > { %476 = vmatmul.mubr.bf16.vlgmr.msra.gmra.mrb[0].mxu0 %v339_v27  ;;  %516 = vmatmul.mubr.bf16.vlgmr.msra.gmra.mrb[0].mxu1 %v343_v28 }
  0x3c   : > { %485 = vmatprep.mubr.bf16.mxu0 %v1867_v12  ;;  %525 = vmatprep.mubr.bf16.mxu1 %v1867_v12 }
  0x43   : > { %486 = vmatmul.mubr.bf16.gmra.mrb[4].mxu0 %v340_v29  ;;  %526 = vmatmul.mubr.bf16.gmra.mrb[4].mxu1 %v344_v30 }
  0x44   : > { %495 = vmatprep.mubr.bf16.mxu0 %v1867_v12  ;;  %535 = vmatprep.mubr.bf16.mxu1 %v1867_v12 }
  0x4b   : > { %496 = vmatmul.mubr.bf16.gmra.mrb[8].mxu0 %v341_v31  ;;  %536 = vmatmul.mubr.bf16.gmra.mrb[8].mxu1 %v345_v32 }
  0x4c   : > { %505 = vmatprep.mubr.bf16.mxu0 %v1867_v12  ;;  %545 = vmatprep.mubr.bf16.mxu1 %v1867_v12 }
  0x53   : > { %506 = vmatmul.mubr.bf16.gmra.mrb[12].mxu0 %v342_v33  ;;  %546 = vmatmul.mubr.bf16.gmra.mrb[12].mxu1 %v346_v34 }
 0x10e   : > { %v477_v35 = vpop.f32.mrb[0].mxu0  ;;  %v2012_v36 = vpop.f32.mrb[0].mxu1 }
 0x10f   : > { %v479_v37 = vpop.f32.mrb[1].mxu0  ;;  %v2014_v38 = vpop.f32.mrb[1].mxu1  ;;  %v659_v39 = vmul.f32 %v477_v35, %v477_v35 }
 0x110   : > { %v481_v40 = vpop.f32.mrb[2].mxu0  ;;  %v2016_v41 = vpop.f32.mrb[2].mxu1  ;;  %v660_v48 = vmul.f32 %v479_v37, %v479_v37 }
 0x111   : > { %v556_v42 = vpack.c.bf16 %v481_v40, %v477_v35  ;;  %v592_v43 = vadd.f32 %v481_v40, %v477_v35  ;;  %v661_v44 = vmul.f32 %v481_v40, %v481_v40  ;;  %v483_v45 = vpop.f32.mrb[3].mxu0  ;;  %v564_v46 = vpack.c.bf16 %v2016_v41, %v2012_v36  ;;  %v2020_v47 = vpop.f32.mrb[3].mxu1 }
 0x112   : > { %v557_v49 = vpack.c.bf16 %v483_v45, %v479_v37  ;;  %v613_v50 = vadd.f32 %v483_v45, %v479_v37  ;;  %v662_v51 = vmul.f32 %v483_v45, %v483_v45  ;;  %v565_v53 = vpack.c.bf16 %v2020_v47, %v2014_v38 }
 0x113   : > { %575 = vst [vmem:[#allocation4] sm:$0xff] %v556_v42  ;;  %v691_v52 = vadd.f32 %v661_v44, %v659_v39  ;;  %583 = vst [vmem:[#allocation4 + $0x40] sm:$0xff] %v564_v46 }
 0x114   : > { %576 = vst [vmem:[#allocation4 + $0x8] sm:$0xff] %v557_v49  ;;  %v712_v54 = vadd.f32 %v662_v51, %v660_v48  ;;  %584 = vst [vmem:[#allocation4 + $0x48] sm:$0xff] %v565_v53 }
 0x116   : > { %v487_v55 = vpop.f32.mrb[4].mxu0  ;;  %v2024_v56 = vpop.f32.mrb[4].mxu1 }
 0x117   : > { %v593_v57 = vadd.f32 %v592_v43, %v487_v55  ;;  %v663_v58 = vmul.f32 %v487_v55, %v487_v55  ;;  %v489_v59 = vpop.f32.mrb[5].mxu0  ;;  %v2026_v60 = vpop.f32.mrb[5].mxu1 }
 0x118   : > { %v614_v61 = vadd.f32 %v613_v50, %v489_v59  ;;  %v664_v62 = vmul.f32 %v489_v59, %v489_v59  ;;  %v491_v63 = vpop.f32.mrb[6].mxu0  ;;  %v2028_v0 = vpop.f32.mrb[6].mxu1 }
 0x119   : > { %v692_v1 = vadd.f32 %v691_v52, %v663_v58  ;;  %v558_v2 = vpack.c.bf16 %v491_v63, %v487_v55  ;;  %v594_v3 = vadd.f32 %v593_v57, %v491_v63  ;;  %v665_v4 = vmul.f32 %v491_v63, %v491_v63  ;;  %v493_v5 = vpop.f32.mrb[7].mxu0  ;;  %v2030_v6 = vpop.f32.mrb[7].mxu1 }
 0x11a   : > { %v713_v7 = vadd.f32 %v712_v54, %v664_v62  ;;  %v559_v8 = vpack.c.bf16 %v493_v5, %v489_v59  ;;  %v615_v9 = vadd.f32 %v614_v61, %v493_v5  ;;  %v666_v10 = vmul.f32 %v493_v5, %v493_v5 }
 0x11b   : > { %577 = vst [vmem:[#allocation4 + $0x10] sm:$0xff] %v558_v2  ;;  %v693_v11 = vadd.f32 %v692_v1, %v665_v4  ;;  %v566_v12 = vpack.c.bf16 %v2028_v0, %v2024_v56  ;;  %v567_v13 = vpack.c.bf16 %v2030_v6, %v2026_v60  ;;  %v675_v2 = vmul.f32 %v2012_v36, %v2012_v36 }
 0x11c   : > { %578 = vst [vmem:[#allocation4 + $0x18] sm:$0xff] %v559_v8  ;;  %v714_v14 = vadd.f32 %v713_v7, %v666_v10  ;;  %v676_v7 = vmul.f32 %v2014_v38, %v2014_v38 }
 0x11d   : > { %585 = vst [vmem:[#allocation4 + $0x50] sm:$0xff] %v566_v12  ;;  %586 = vst [vmem:[#allocation4 + $0x58] sm:$0xff] %v567_v13 }
 0x11e   : > { %v497_v15 = vpop.f32.mrb[8].mxu0  ;;  %v2036_v16 = vpop.f32.mrb[8].mxu1 }
 0x11f   : > { %v595_v17 = vadd.f32 %v594_v3, %v497_v15  ;;  %v667_v18 = vmul.f32 %v497_v15, %v497_v15  ;;  %v499_v19 = vpop.f32.mrb[9].mxu0  ;;  %v2038_v20 = vpop.f32.mrb[9].mxu1 }
 0x120   : > { %v616_v21 = vadd.f32 %v615_v9, %v499_v19  ;;  %v668_v22 = vmul.f32 %v499_v19, %v499_v19  ;;  %v501_v23 = vpop.f32.mrb[10].mxu0  ;;  %v2040_v24 = vpop.f32.mrb[10].mxu1 }
 0x121   : > { %v694_v25 = vadd.f32 %v693_v11, %v667_v18  ;;  %v560_v26 = vpack.c.bf16 %v501_v23, %v497_v15  ;;  %v596_v27 = vadd.f32 %v595_v17, %v501_v23  ;;  %v669_v28 = vmul.f32 %v501_v23, %v501_v23  ;;  %v503_v29 = vpop.f32.mrb[11].mxu0  ;;  %v2042_v30 = vpop.f32.mrb[11].mxu1 }
 0x122   : > { %v715_v31 = vadd.f32 %v714_v14, %v668_v22  ;;  %v561_v32 = vpack.c.bf16 %v503_v29, %v499_v19  ;;  %v617_v33 = vadd.f32 %v616_v21, %v503_v29  ;;  %v670_v34 = vmul.f32 %v503_v29, %v503_v29 }
 0x123   : > { %579 = vst [vmem:[#allocation4 + $0x20] sm:$0xff] %v560_v26  ;;  %v695_v35 = vadd.f32 %v694_v25, %v669_v28  ;;  %v568_v37 = vpack.c.bf16 %v2040_v24, %v2036_v16  ;;  %v569_v39 = vpack.c.bf16 %v2042_v30, %v2038_v20  ;;  %v677_v11 = vmul.f32 %v2016_v41, %v2016_v41 }
 0x124   : > { %580 = vst [vmem:[#allocation4 + $0x28] sm:$0xff] %v561_v32  ;;  %v716_v40 = vadd.f32 %v715_v31, %v670_v34  ;;  %v679_v17 = vmul.f32 %v2024_v56, %v2024_v56  ;;  %v680_v19 = vmul.f32 %v2026_v60, %v2026_v60  ;;  %v681_v22 = vmul.f32 %v2028_v0, %v2028_v0 }
 0x125   : > { %587 = vst [vmem:[#allocation4 + $0x60] sm:$0xff] %v568_v37  ;;  %588 = vst [vmem:[#allocation4 + $0x68] sm:$0xff] %v569_v39  ;;  %v682_v25 = vmul.f32 %v2030_v6, %v2030_v6  ;;  %v683_v28 = vmul.f32 %v2036_v16, %v2036_v16  ;;  %v684_v31 = vmul.f32 %v2038_v20, %v2038_v20 }
 0x126   : > { %v507_v42 = vpop.f32.mrb[12].mxu0  ;;  %v2048_v43 = vpop.f32.mrb[12].mxu1  ;;  %v685_v34 = vmul.f32 %v2040_v24, %v2040_v24 }
 0x127   : > { %v597_v44 = vadd.f32 %v596_v27, %v507_v42  ;;  %v671_v45 = vmul.f32 %v507_v42, %v507_v42  ;;  %v509_v46 = vpop.f32.mrb[13].mxu0  ;;  %v549_v48 = vpop.f32.mrb[13].mxu1 }
 0x128   : > { %v618_v49 = vadd.f32 %v617_v33, %v509_v46  ;;  %v672_v50 = vmul.f32 %v509_v46, %v509_v46  ;;  %v511_v51 = vpop.f32.mrb[14].mxu0  ;;  %v551_v52 = vpop.f32.mrb[14].mxu1  ;;  %v688_v39 = vmul.f32 %v549_v48, %v549_v48 }
 0x129   : > { %v696_v53 = vadd.f32 %v695_v35, %v671_v45  ;;  %v562_v54 = vpack.c.bf16 %v511_v51, %v507_v42  ;;  %v598_v55 = vadd.f32 %v597_v44, %v511_v51  ;;  %v673_v57 = vmul.f32 %v511_v51, %v511_v51  ;;  %v513_v58 = vpop.f32.mrb[15].mxu0  ;;  %v553_v59 = vpop.f32.mrb[15].mxu1 }
 0x12a   : > { %v717_v61 = vadd.f32 %v716_v40, %v672_v50  ;;  %v563_v62 = vpack.c.bf16 %v513_v58, %v509_v46  ;;  %v619_v63 = vadd.f32 %v618_v49, %v513_v58  ;;  %v674_v1 = vmul.f32 %v513_v58, %v513_v58 }
 0x12b   : > { %581 = vst [vmem:[#allocation4 + $0x30] sm:$0xff] %v562_v54  ;;  %v599_v3 = vadd.f32 %v598_v55, %v2012_v36  ;;  %v697_v4 = vadd.f32 %v696_v53, %v673_v57  ;;  %v570_v5 = vpack.c.bf16 %v551_v52, %v2048_v43  ;;  %v571_v10 = vpack.c.bf16 %v553_v59, %v549_v48 }
 0x12c   : > { %582 = vst [vmem:[#allocation4 + $0x38] sm:$0xff] %v563_v62  ;;  %v620_v8 = vadd.f32 %v619_v63, %v2014_v38  ;;  %v718_v9 = vadd.f32 %v717_v61, %v674_v1  ;;  %v678_v36 = vmul.f32 %v2020_v47, %v2020_v47  ;;  %v689_v49 = vmul.f32 %v551_v52, %v551_v52 }
 0x12d   : > { %v600_v12 = vadd.f32 %v599_v3, %v2016_v41  ;;  %v698_v13 = vadd.f32 %v697_v4, %v675_v2  ;;  %589 = vst [vmem:[#allocation4 + $0x70] sm:$0xff] %v570_v5  ;;  %590 = vst [vmem:[#allocation4 + $0x78] sm:$0xff] %v571_v10  ;;  %v690_v51 = vmul.f32 %v553_v59, %v553_v59  ;;  %v640_v1 = vlaneseq }
 0x12e   : > { %v621_v14 = vadd.f32 %v620_v8, %v2020_v47  ;;  %v719_v15 = vadd.f32 %v718_v9, %v676_v7 }
 0x12f   : > { %v699_v38 = vadd.f32 %v698_v13, %v677_v11  ;;  %v601_v18 = vadd.f32 %v600_v12, %v2024_v56  ;;  %vm655_vm1 = vcmp.lt.s32.totalorder %v640_v1, 256 }
 0x130   : > { %v720_v21 = vadd.f32 %v719_v15, %v678_v36  ;;  %v622_v41 = vadd.f32 %v621_v14, %v2026_v60 }
 0x131   : > { %v602_v23 = vadd.f32 %v601_v18, %v2028_v0  ;;  %v700_v47 = vadd.f32 %v699_v38, %v679_v17 }
 0x132   : > { %v623_v26 = vadd.f32 %v622_v41, %v2030_v6  ;;  %v721_v27 = vadd.f32 %v720_v21, %v680_v19  ;;  %v687_v6 = vmul.f32 %v2048_v43, %v2048_v43 }
 0x133   : > { %v603_v56 = vadd.f32 %v602_v23, %v2036_v16  ;;  %v701_v29 = vadd.f32 %v700_v47, %v681_v22  ;;  %v686_v16 = vmul.f32 %v2042_v30, %v2042_v30  ;;  %v591_v23 = vld [vmem:[#allocation6] sm:$0x3] }
 0x134   : > { %v624_v60 = vadd.f32 %v623_v26, %v2038_v20  ;;  %v722_v32 = vadd.f32 %v721_v27, %v682_v25  ;;  %v658_v26 = vld [vmem:[#allocation7] sm:$0x3] }
 0x135   : > { %v702_v0 = vadd.f32 %v701_v29, %v683_v28  ;;  %v604_v33 = vadd.f32 %v603_v56, %v2040_v24 }
 0x136   : > { %v723_v35 = vadd.f32 %v722_v32, %v684_v31  ;;  %v625_v37 = vadd.f32 %v624_v60, %v2042_v30  ;;  %v1868_v30 = vmov 1966171168  }
 0x137   : > { %v703_v40 = vadd.f32 %v702_v0, %v685_v34  ;;  %v605_v20 = vadd.f32 %v604_v33, %v2048_v43  ;;  %v638_v63 = vunpack.c.l.s4 %v1868_v30 }
 0x138   : > { %v724_v42 = vadd.f32 %v723_v35, %v686_v16  ;;  %v626_v44 = vadd.f32 %v625_v37, %v549_v48 }
 0x139   : > { %v704_v45 = vadd.f32 %v703_v40, %v687_v6  ;;  %v606_v46 = vadd.f32 %v605_v20, %v551_v52  ;;  %v639_v8 = vunpack.c.0.s8 %v638_v63 }
 0x13a   : > { %v725_v50 = vadd.f32 %v724_v42, %v688_v39  ;;  %v627_v24 = vadd.f32 %v626_v44, %v553_v59  ;;  %v641_v59 = vshrl.u32 %v640_v1, 7 }
 0x13b   : > { %v607_v53 = vrot.slane %v606_v46, 4  ;;  %v705_v54 = vadd.f32 %v704_v45, %v689_v49 }
 0x13c   : > { %v628_v55 = vrot.slane %v627_v24, 4  ;;  %v726_v57 = vadd.f32 %v725_v50, %v690_v51  ;;  %v642_v17 = vsub.s32 %v639_v8, %v641_v59 }
 0x13d   : > { %v608_v58 = vadd.f32 %v607_v53, %v606_v46  ;;  %v706_v61 = vrot.slane %v705_v54, 4 }
 0x13e   : > { %v629_v62 = vadd.f32 %v628_v55, %v627_v24  ;;  %v727_v2 = vrot.slane %v726_v57, 4 }
 0x13f   : > { %v609_v43 = vrot.slane %v608_v58, 2  ;;  %v707_v3 = vadd.f32 %v706_v61, %v705_v54 }
 0x140   : > { %v630_v48 = vrot.slane %v629_v62, 2  ;;  %v728_v4 = vadd.f32 %v727_v2, %v726_v57 }
 0x141   : > { %v610_v5 = vadd.f32 %v609_v43, %v608_v58  ;;  %v708_v52 = vrot.slane %v707_v3, 2 }
 0x142   : > { %v631_v7 = vadd.f32 %v630_v48, %v629_v62  ;;  %v729_v9 = vrot.slane %v728_v4, 2 }
 0x143   : > { %v611_v10 = vrot.slane %v610_v5, 1  ;;  %v709_v11 = vadd.f32 %v708_v52, %v707_v3 }
 0x144   : > { %v632_v12 = vrot.slane %v631_v7, 1  ;;  %v730_v13 = vadd.f32 %v729_v9, %v728_v4 }
 0x145   : > { %v612_v36 = vadd.f32 %v611_v10, %v610_v5  ;;  %v710_v14 = vrot.slane %v709_v11, 1 }
 0x146   : > { %v633_v15 = vadd.f32 %v632_v12, %v631_v7  ;;  %v731_v38 = vrot.slane %v730_v13, 1 }
 0x147   : > { %v711_v18 = vadd.f32 %v710_v14, %v709_v11 }
 0x148   : > { %v636_v19 = vcombine.low %v612_v36, %v633_v15  ;;  %v732_v21 = vadd.f32 %v731_v38, %v730_v13 }
 0x14a   : > { %v643_v41 = vrot.slane %v636_v19, %v642_v17  ;;  %v735_v22 = vcombine.low %v711_v18, %v732_v21 }
 0x14c   : > { %v650_v47 = vrot.slane %v643_v41, %v642_v17  ;;  %v742_v25 = vrot.slane %v735_v22, %v642_v17 }
 0x14e   : > { %v652_v27 = vadd.f32 %v650_v47, %v591_v23  ;;  %v749_v56 = vrot.slane %v742_v25, %v642_v17 }
 0x150   : > { %657 = vst.msk [vmem:[#allocation6] sm:$0x3] %vm655_vm1, %v652_v27  ;;  %v751_v28 = vadd.f32 %v749_v56, %v658_v26 }
 0x152   : > { %752 = vst.msk [vmem:[#allocation7] sm:$0x3] %vm655_vm1, %v751_v28 }
 0x153 PF: > { %p1661_p6 = scmp.ne.s32.totalorder %s1856_s24, 1 }
 0x154   : > { %v771_v35 = vlaneseq (!%p1661_p6)  ;;  %v767_v37 = vld [vmem:[%s2381_s3] sm:$0x3] (!%p1661_p6)  ;;  %v786_v44 = vld [vmem:[#allocation4 + $0x8] sm:$0xff] (!%p1661_p6)  ;;  %v787_v46 = vld [vmem:[#allocation4 + $0x10] sm:$0xff] (!%p1661_p6) }
 0x155   : > { %756 = sbr.rel (%p1661_p6) target bundleno = 411 (0x19b), region = 90  ;;  %v785_v20 = vld [vmem:[#allocation4] sm:$0xff] (!%p1661_p6)  ;;  %v788_v24 = vld [vmem:[#allocation4 + $0x18] sm:$0xff] (!%p1661_p6)  ;;  %v802_v57 = vunpack.c.l.bf16 (!%p1661_p6), %v786_v44  ;;  %v790_v58 = vld [vmem:[#allocation4 + $0x28] sm:$0xff] (!%p1661_p6)  ;;  %v804_v30 = vunpack.c.h.bf16 (!%p1661_p6), %v786_v44  ;;  %v805_v63 = vunpack.c.l.bf16 (!%p1661_p6), %v787_v46  ;;  %v807_v1 = vunpack.c.h.bf16 (!%p1661_p6), %v787_v46 }
 0x156   : > { %vm2094_vm2 = vcmp.lt.s32.totalorder (!%p1661_p6), %v771_v35, 256  ;;  %v2098_v40 = vshrl.u32 (!%p1661_p6), %v771_v35, 7  ;;  %v776_v45 = vld [vmem:[%s2382_s4] sm:$0x3] (!%p1661_p6)  ;;  %v801_v50 = vunpack.c.l.bf16 (!%p1661_p6), %v785_v20  ;;  %v803_v55 = vunpack.c.h.bf16 (!%p1661_p6), %v785_v20  ;;  %v791_v61 = vld [vmem:[#allocation4 + $0x30] sm:$0xff] (!%p1661_p6)  ;;  %v2109_v2 = vld [vmem:[#allocation4 + $0x38] sm:$0xff] (!%p1661_p6) }
 0x157   : > { %v760_v29 = vld [vmem:[#allocation6] sm:$0x3] (!%p1661_p6)  ;;  %v806_v3 = vunpack.c.l.bf16 (!%p1661_p6), %v788_v24  ;;  %v808_v48 = vunpack.c.h.bf16 (!%p1661_p6), %v788_v24  ;;  %v2115_v52 = vld [vmem:[#allocation4 + $0x48] sm:$0xff] (!%p1661_p6)  ;;  %v2117_v7 = vld [vmem:[#allocation4 + $0x50] sm:$0xff] (!%p1661_p6)  ;;  %v810_v8 = vunpack.c.l.bf16 (!%p1661_p6), %v790_v58  ;;  %v812_v59 = vunpack.c.h.bf16 (!%p1661_p6), %v790_v58 }
 0x158   : > { %v761_v31 = vmul.f32 (!%p1661_p6), 0.025, %v760_v29  ;;  %v2105_v51 = vld [vmem:[#allocation4 + $0x20] sm:$0xff] (!%p1661_p6)  ;;  %v837_v53 = vsub.s32 (!%p1661_p6), 0, %v2098_v40  ;;  %v841_v54 = vsub.s32 (!%p1661_p6), 1, %v2098_v40  ;;  %v813_v9 = vunpack.c.l.bf16 (!%p1661_p6), %v791_v61  ;;  %v2121_v11 = vld [vmem:[#allocation4 + $0x58] sm:$0xff] (!%p1661_p6) }
 0x159   : > { %v762_v60 = vld [vmem:[#allocation7] sm:$0x3] (!%p1661_p6)  ;;  %v809_v4 = vunpack.c.l.bf16 (!%p1661_p6), %v2105_v51  ;;  %v811_v5 = vunpack.c.h.bf16 (!%p1661_p6), %v2105_v51  ;;  %v815_v10 = vunpack.c.h.bf16 (!%p1661_p6), %v791_v61  ;;  %v814_v13 = vunpack.c.l.bf16 (!%p1661_p6), %v2109_v2  ;;  %v2129_v17 = vld [vmem:[#allocation4 + $0x68] sm:$0xff] (!%p1661_p6)  ;;  %v2135_v41 = vld [vmem:[#allocation4 + $0x70] sm:$0xff] (!%p1661_p6) }
 0x15a   : > { %v763_v32 = vmul.f32 (!%p1661_p6), 0.025, %v762_v60  ;;  %v764_v0 = vmul.f32 (!%p1661_p6), %v761_v31, %v761_v31  ;;  %v2111_v43 = vld [vmem:[#allocation4 + $0x40] sm:$0xff] (!%p1661_p6)  ;;  %v816_v36 = vunpack.c.h.bf16 (!%p1661_p6), %v2109_v2  ;;  %v818_v38 = vunpack.c.l.bf16 (!%p1661_p6), %v2115_v52  ;;  %v2137_v22 = vld [vmem:[#allocation4 + $0x78] sm:$0xff] (!%p1661_p6) }
 0x15b   : > { %v2123_v12 = vld [vmem:[#allocation4 + $0x60] sm:$0xff] (!%p1661_p6)  ;;  %v817_v14 = vunpack.c.l.bf16 (!%p1661_p6), %v2111_v43  ;;  %v819_v15 = vunpack.c.h.bf16 (!%p1661_p6), %v2111_v43  ;;  %v820_v18 = vunpack.c.h.bf16 (!%p1661_p6), %v2115_v52  ;;  %v821_v19 = vunpack.c.l.bf16 (!%p1661_p6), %v2117_v7 }
 0x15c   : > { %v765_v33 = vsub.f32 %v763_v32, %v764_v0  ;;  %v823_v21 = vunpack.c.h.bf16 %v2117_v7  ;;  %v822_v47 = vunpack.c.l.bf16 %v2121_v11  ;;  %v824_v25 = vunpack.c.h.bf16 %v2121_v11 }
 0x15d   : > { %v825_v26 = vunpack.c.l.bf16 %v2123_v12  ;;  %v827_v27 = vunpack.c.h.bf16 %v2123_v12  ;;  %v826_v29 = vunpack.c.l.bf16 %v2129_v17  ;;  %v828_v60 = vunpack.c.h.bf16 %v2129_v17 }
 0x15e   : > { %v766_v34 = vmax.f32 %v765_v33, 0.0  ;;  %v831_v32 = vunpack.c.h.bf16 %v2135_v41  ;;  %v830_v0 = vunpack.c.l.bf16 %v2137_v22  ;;  %v832_v33 = vunpack.c.h.bf16 %v2137_v22 }
 0x160   : > { %v768_v6 = vadd.f32 1e-05, %v766_v34 }
 0x162   : > { %1820 = vrsqrt.f32 %v768_v6 }
 0x16c   : > { %v1821_v16 = vpop.eup %1820 }
 0x16d   : > { %v770_v42 = vmul.f32 %v1821_v16, %v767_v37 }
 0x16f   : > { %775 = vst.msk [vmem:[#allocation6] sm:$0x3] %vm2094_vm2, %v770_v42  ;;  %v777_v49 = vmul.f32 %v770_v42, %v761_v31  ;;  %v829_v31 = vunpack.c.l.bf16 %v2135_v41 }
 0x171   : > { %v778_v62 = vsub.f32 %v776_v45, %v777_v49 }
 0x173   : > { %779 = vst.msk [vmem:[#allocation7] sm:$0x3] %vm2094_vm2, %v778_v62 }
 0x176   : > { %v833_v23 = vld [vmem:[#allocation6] sm:$0x3] }
 0x177   : > { %v2143_v56 = vrot.slane %v833_v23, %v837_v53  ;;  %v2145_v28 = vrot.slane %v833_v23, %v841_v54 }
 0x179   : > { %v845_v34 = vmul.f32 %v2143_v56, %v801_v50  ;;  %v847_v6 = vmul.f32 %v2143_v56, %v803_v55  ;;  %v846_v35 = vmul.f32 %v2145_v28, %v802_v57  ;;  %v848_v37 = vmul.f32 %v2145_v28, %v804_v30 }
 0x17a   : > { %v877_v16 = vld [vmem:[#allocation7] sm:$0x3]  ;;  %v849_v39 = vmul.f32 %v2143_v56, %v805_v63  ;;  %v851_v40 = vmul.f32 %v2143_v56, %v807_v1  ;;  %v850_v20 = vmul.f32 %v2145_v28, %v806_v3  ;;  %v852_v42 = vmul.f32 %v2145_v28, %v808_v48 }
 0x17b   : > { %v2161_v44 = vrot.slane %v877_v16, %v837_v53  ;;  %v2163_v45 = vrot.slane %v877_v16, %v841_v54  ;;  %v853_v46 = vmul.f32 %v2143_v56, %v809_v4  ;;  %v855_v49 = vmul.f32 %v2143_v56, %v811_v5 }
 0x17c   : > { %v854_v50 = vmul.f32 %v2145_v28, %v810_v8  ;;  %v856_v24 = vmul.f32 %v2145_v28, %v812_v59  ;;  %v857_v51 = vmul.f32 %v2143_v56, %v813_v9  ;;  %v859_v55 = vmul.f32 %v2143_v56, %v815_v10 }
 0x17d   : > { %v889_v57 = vadd.f32 %v2161_v44, %v845_v34  ;;  %v891_v58 = vadd.f32 %v2161_v44, %v847_v6  ;;  %v890_v53 = vadd.f32 %v2163_v45, %v846_v35  ;;  %v892_v54 = vadd.f32 %v2163_v45, %v848_v37 }
 0x17e   : > { %v893_v61 = vadd.f32 %v2161_v44, %v849_v39  ;;  %v895_v62 = vadd.f32 %v2161_v44, %v851_v40  ;;  %v894_v30 = vadd.f32 %v2163_v45, %v850_v20  ;;  %v896_v63 = vadd.f32 %v2163_v45, %v852_v42 }
 0x17f   : > { %v921_v1 = vmax.f32 %v889_v57, 0.0  ;;  %v923_v3 = vmax.f32 %v891_v58, 0.0  ;;  %v922_v48 = vmax.f32 %v890_v53, 0.0  ;;  %v924_v4 = vmax.f32 %v892_v54, 0.0 }
 0x180   : > { %v925_v5 = vmax.f32 %v893_v61, 0.0  ;;  %v927_v8 = vmax.f32 %v895_v62, 0.0  ;;  %v926_v59 = vmax.f32 %v894_v30, 0.0  ;;  %v928_v9 = vmax.f32 %v896_v63, 0.0 }
 0x181   : > { %v953_v10 = vpack.c.bf16 %v923_v3, %v921_v1  ;;  %v954_v23 = vpack.c.bf16 %v924_v4, %v922_v48  ;;  %v897_v34 = vadd.f32 %v2161_v44, %v853_v46  ;;  %v899_v6 = vadd.f32 %v2161_v44, %v855_v49 }
 0x182   : > { %v955_v35 = vpack.c.bf16 %v927_v8, %v925_v5  ;;  %v956_v37 = vpack.c.bf16 %v928_v9, %v926_v59  ;;  %v898_v16 = vadd.f32 %v2163_v45, %v854_v50  ;;  %v900_v39 = vadd.f32 %v2163_v45, %v856_v24 }
 0x183   : > { %969 = vst [vmem:[#allocation4] sm:$0xff] %v953_v10  ;;  %970 = vst [vmem:[#allocation4 + $0x8] sm:$0xff] %v954_v23  ;;  %v929_v40 = vmax.f32 %v897_v34, 0.0  ;;  %v931_v20 = vmax.f32 %v899_v6, 0.0  ;;  %v901_v42 = vadd.f32 %v2161_v44, %v857_v51  ;;  %v903_v57 = vadd.f32 %v2161_v44, %v859_v55 }
 0x184   : > { %971 = vst [vmem:[#allocation4 + $0x10] sm:$0xff] %v955_v35  ;;  %972 = vst [vmem:[#allocation4 + $0x18] sm:$0xff] %v956_v37  ;;  %v930_v58 = vmax.f32 %v898_v16, 0.0  ;;  %v932_v46 = vmax.f32 %v900_v39, 0.0  ;;  %v858_v49 = vmul.f32 %v2145_v28, %v814_v13  ;;  %v860_v50 = vmul.f32 %v2145_v28, %v816_v36 }
 0x185   : > { %v957_v24 = vpack.c.bf16 %v931_v20, %v929_v40  ;;  %v933_v53 = vmax.f32 %v901_v42, 0.0  ;;  %v935_v54 = vmax.f32 %v903_v57, 0.0  ;;  %v861_v51 = vmul.f32 %v2143_v56, %v817_v14 }
 0x186   : > { %v958_v55 = vpack.c.bf16 %v932_v46, %v930_v58  ;;  %v902_v61 = vadd.f32 %v2163_v45, %v858_v49  ;;  %v904_v62 = vadd.f32 %v2163_v45, %v860_v50  ;;  %v863_v13 = vmul.f32 %v2143_v56, %v819_v15 }
 0x187   : > { %973 = vst [vmem:[#allocation4 + $0x20] sm:$0xff] %v957_v24  ;;  %v959_v2 = vpack.c.bf16 %v935_v54, %v933_v53  ;;  %v905_v36 = vadd.f32 %v2161_v44, %v861_v51  ;;  %v862_v30 = vmul.f32 %v2145_v28, %v818_v38  ;;  %v864_v14 = vmul.f32 %v2145_v28, %v820_v18 }
 0x188   : > { %974 = vst [vmem:[#allocation4 + $0x28] sm:$0xff] %v958_v55  ;;  %v934_v63 = vmax.f32 %v902_v61, 0.0  ;;  %v936_v1 = vmax.f32 %v904_v62, 0.0  ;;  %v907_v3 = vadd.f32 %v2161_v44, %v863_v13  ;;  %v865_v43 = vmul.f32 %v2143_v56, %v821_v19 }
 0x189   : > { %975 = vst [vmem:[#allocation4 + $0x30] sm:$0xff] %v959_v2  ;;  %v937_v15 = vmax.f32 %v905_v36, 0.0  ;;  %v906_v48 = vadd.f32 %v2163_v45, %v862_v30  ;;  %v908_v4 = vadd.f32 %v2163_v45, %v864_v14  ;;  %v867_v52 = vmul.f32 %v2143_v56, %v823_v21 }
 0x18a   : > { %v960_v38 = vpack.c.bf16 %v936_v1, %v934_v63  ;;  %v939_v18 = vmax.f32 %v907_v3, 0.0  ;;  %v909_v5 = vadd.f32 %v2161_v44, %v865_v43  ;;  %v866_v8 = vmul.f32 %v2145_v28, %v822_v47 }
 0x18b   : > { %v938_v59 = vmax.f32 %v906_v48, 0.0  ;;  %v940_v19 = vmax.f32 %v908_v4, 0.0  ;;  %v911_v9 = vadd.f32 %v2161_v44, %v867_v52  ;;  %v868_v10 = vmul.f32 %v2145_v28, %v824_v25 }
 0x18c   : > { %976 = vst [vmem:[#allocation4 + $0x38] sm:$0xff] %v960_v38  ;;  %v961_v7 = vpack.c.bf16 %v939_v18, %v937_v15  ;;  %v941_v23 = vmax.f32 %v909_v5, 0.0  ;;  %v910_v21 = vadd.f32 %v2163_v45, %v866_v8  ;;  %v869_v34 = vmul.f32 %v2143_v56, %v825_v26 }
 0x18d   : > { %v962_v6 = vpack.c.bf16 %v940_v19, %v938_v59  ;;  %v943_v35 = vmax.f32 %v911_v9, 0.0  ;;  %v912_v47 = vadd.f32 %v2163_v45, %v868_v10  ;;  %v871_v37 = vmul.f32 %v2143_v56, %v827_v27 }
 0x18e   : > { %977 = vst [vmem:[#allocation4 + $0x40] sm:$0xff] %v961_v7  ;;  %v942_v11 = vmax.f32 %v910_v21, 0.0  ;;  %v913_v25 = vadd.f32 %v2161_v44, %v869_v34  ;;  %v870_v16 = vmul.f32 %v2145_v28, %v826_v29  ;;  %v872_v26 = vmul.f32 %v2145_v28, %v828_v60 }
 0x18f   : > { %978 = vst [vmem:[#allocation4 + $0x48] sm:$0xff] %v962_v6  ;;  %v963_v39 = vpack.c.bf16 %v943_v35, %v941_v23  ;;  %v944_v40 = vmax.f32 %v912_v47, 0.0  ;;  %v915_v20 = vadd.f32 %v2161_v44, %v871_v37  ;;  %v873_v12 = vmul.f32 %v2143_v56, %v829_v31 }
 0x190   : > { %v945_v27 = vmax.f32 %v913_v25, 0.0  ;;  %v914_v42 = vadd.f32 %v2163_v45, %v870_v16  ;;  %v916_v57 = vadd.f32 %v2163_v45, %v872_v26  ;;  %v875_v17 = vmul.f32 %v2143_v56, %v831_v32 }
 0x191   : > { %979 = vst [vmem:[#allocation4 + $0x50] sm:$0xff] %v963_v39  ;;  %v964_v29 = vpack.c.bf16 %v944_v40, %v942_v11  ;;  %v947_v60 = vmax.f32 %v915_v20, 0.0  ;;  %v917_v58 = vadd.f32 %v2161_v44, %v873_v12  ;;  %v874_v46 = vmul.f32 %v2145_v28, %v830_v0 }
 0x192   : > { %v946_v49 = vmax.f32 %v914_v42, 0.0  ;;  %v948_v31 = vmax.f32 %v916_v57, 0.0  ;;  %v919_v50 = vadd.f32 %v2161_v44, %v875_v17  ;;  %v876_v24 = vmul.f32 %v2145_v28, %v832_v33 }
 0x193   : > { %980 = vst [vmem:[#allocation4 + $0x58] sm:$0xff] %v964_v29  ;;  %v965_v41 = vpack.c.bf16 %v947_v60, %v945_v27  ;;  %v949_v56 = vmax.f32 %v917_v58, 0.0  ;;  %v918_v32 = vadd.f32 %v2163_v45, %v874_v46 }
 0x194   : > { %v966_v53 = vpack.c.bf16 %v948_v31, %v946_v49  ;;  %v951_v54 = vmax.f32 %v919_v50, 0.0  ;;  %v920_v51 = vadd.f32 %v2163_v45, %v876_v24 }
 0x195   : > { %981 = vst [vmem:[#allocation4 + $0x60] sm:$0xff] %v965_v41  ;;  %v950_v55 = vmax.f32 %v918_v32, 0.0 }
 0x196   : > { %982 = vst [vmem:[#allocation4 + $0x68] sm:$0xff] %v966_v53  ;;  %v967_v0 = vpack.c.bf16 %v951_v54, %v949_v56  ;;  %v952_v61 = vmax.f32 %v920_v51, 0.0 }
 0x198   : > { %983 = vst [vmem:[#allocation4 + $0x70] sm:$0xff] %v967_v0  ;;  %v968_v44 = vpack.c.bf16 %v952_v61, %v950_v55 }
 0x19a   : > { %984 = vst [vmem:[#allocation4 + $0x78] sm:$0xff] %v968_v44 }
 0x19b PF: > { %p1662_p7 = scmp.ne.s32.totalorder %s1856_s24, 2 }
 0x19c   : > { %v1002_v22 = vld [vmem:[#allocation4 + $0x8] sm:$0xff] (!%p1662_p7)  ;;  %v1001_v28 = vld [vmem:[#allocation4] sm:$0xff] (!%p1662_p7)  ;;  %v1004_v33 = vld [vmem:[#allocation4 + $0x18] sm:$0xff] (!%p1662_p7)  ;;  %v1869_v62 = vmov (!%p1662_p7), 0  }
 0x19d   : > { %988 = sbr.rel (%p1662_p7) target bundleno = 955 (0x3bb), region = 98  ;;  %1017 = vmatprep.subr.bf16.mxu0 (!%p1662_p7), %v1002_v22  ;;  %1049 = vmatprep.mubr.bf16.mxu0 (!%p1662_p7), %v1869_v62  ;;  %v1003_v45 = vld [vmem:[#allocation4 + $0x10] sm:$0xff] (!%p1662_p7)  ;;  %v1006_v13 = vld [vmem:[#allocation4 + $0x28] sm:$0xff] (!%p1662_p7)  ;;  %v1005_v2 = vld [vmem:[#allocation4 + $0x20] sm:$0xff] (!%p1662_p7) }
 0x19e   : > { %1018 = vmatpush1.bf16.msra.mxu0 (!%p1662_p7), %v1001_v28  ;;  %v1008_v36 = vld [vmem:[#allocation4 + $0x38] sm:$0xff] (!%p1662_p7)  ;;  %v1822_v30 = vld [vmem:[%s2380_s2 + $0x40] sm:$0xff] (!%p1662_p7)   ;;  %v1007_v14 = vld [vmem:[#allocation4 + $0x30] sm:$0xff] (!%p1662_p7) }
 0x19f   : > { %1019 = vmatprep.subr.bf16.mxu0 (!%p1662_p7), %v1004_v33  ;;  %v1823_v63 = vld [vmem:[%s2380_s2] sm:$0xff] (!%p1662_p7)   ;;  %v1010_v1 = vld [vmem:[#allocation4 + $0x48] sm:$0xff] (!%p1662_p7)  ;;  %1688 = vmatprep.subr.bf16.mxu1 (!%p1662_p7), %v1822_v30  ;;  %v1826_v15 = vld [vmem:[%s2380_s2 + $0x50] sm:$0xff] (!%p1662_p7)  }
 0x1a0   : > { %v1824_v3 = vld [vmem:[%s2380_s2 + $0x48] sm:$0xff] (!%p1662_p7)   ;;  %1689 = vmatpush3.bf16.msra.mxu1 (!%p1662_p7), %v1823_v63  ;;  %v1009_v48 = vld [vmem:[#allocation4 + $0x40] sm:$0xff] (!%p1662_p7)  ;;  %v1012_v4 = vld [vmem:[#allocation4 + $0x58] sm:$0xff] (!%p1662_p7) }
 0x1a1   : > { %v1825_v43 = vld [vmem:[%s2380_s2 + $0x8] sm:$0xff] (!%p1662_p7)   ;;  %1690 = vmatprep.subr.bf16.mxu1 (!%p1662_p7), %v1824_v3  ;;  %v1827_v52 = vld [vmem:[%s2380_s2 + $0x10] sm:$0xff] (!%p1662_p7)   ;;  %v1828_v38 = vld [vmem:[%s2380_s2 + $0x58] sm:$0xff] (!%p1662_p7)  }
 0x1a2   : > { %1020 = vmatpush1.bf16.msra.mxu0 (!%p1662_p7), %v1003_v45  ;;  %v1011_v18 = vld [vmem:[#allocation4 + $0x50] sm:$0xff] (!%p1662_p7)  ;;  %v1014_v5 = vld [vmem:[#allocation4 + $0x68] sm:$0xff] (!%p1662_p7)  ;;  %v1829_v8 = vld [vmem:[%s2380_s2 + $0x18] sm:$0xff] (!%p1662_p7)  }
 0x1a3   : > { %1021 = vmatprep.subr.bf16.mxu0 (!%p1662_p7), %v1006_v13  ;;  %v1830_v59 = vld [vmem:[%s2380_s2 + $0x60] sm:$0xff] (!%p1662_p7)   ;;  %v1016_v10 = vld [vmem:[#allocation4 + $0x78] sm:$0xff] (!%p1662_p7)  ;;  %v1832_v7 = vld [vmem:[%s2380_s2 + $0x68] sm:$0xff] (!%p1662_p7)  }
 0x1a4   : > { %1691 = vmatpush3.bf16.msra.mxu1 %v1825_v43  ;;  %v1013_v19 = vld [vmem:[#allocation4 + $0x60] sm:$0xff]  ;;  %v1015_v23 = vld [vmem:[#allocation4 + $0x70] sm:$0xff]  ;;  %v1833_v21 = vld [vmem:[%s2380_s2 + $0x28] sm:$0xff]  }
 0x1a5   : > { %1692 = vmatprep.subr.bf16.mxu1 %v1826_v15  ;;  %v1831_v9 = vld [vmem:[%s2380_s2 + $0x20] sm:$0xff]   ;;  %v1834_v34 = vld [vmem:[%s2380_s2 + $0x70] sm:$0xff]   ;;  %v994_v35 = vld [vmem:[#allocation2 + $0x8] sm:$0xff] }
 0x1a6   : > { %1022 = vmatpush1.bf16.msra.mxu0 %v1005_v2  ;;  %v993_v6 = vld [vmem:[#allocation2] sm:$0xff]  ;;  %v995_v47 = vld [vmem:[#allocation2 + $0x10] sm:$0xff]  ;;  %v996_v37 = vld [vmem:[#allocation2 + $0x18] sm:$0xff] }
 0x1a7   : > { %1023 = vmatprep.subr.bf16.mxu0 %v1008_v36  ;;  %v997_v11 = vld [vmem:[#allocation2 + $0x20] sm:$0xff]  ;;  %v998_v25 = vld [vmem:[#allocation2 + $0x28] sm:$0xff]  ;;  %v999_v16 = vld [vmem:[#allocation2 + $0x30] sm:$0xff] }
 0x1a8   : > { %1693 = vmatpush3.bf16.msra.mxu1 %v1827_v52  ;;  %v1000_v26 = vld [vmem:[#allocation2 + $0x38] sm:$0xff]  ;;  %v1835_v39 = vld [vmem:[%s2380_s2 + $0x30] sm:$0xff]  }
 0x1a9   : > { %1694 = vmatprep.subr.bf16.mxu1 %v1828_v38  ;;  %v1836_v40 = vld [vmem:[%s2380_s2 + $0x78] sm:$0xff]  }
 0x1aa   : > { %1024 = vmatpush1.bf16.msra.mxu0 %v1007_v14  ;;  %v1837_v20 = vld [vmem:[%s2380_s2 + $0x38] sm:$0xff]  }
 0x1ab   : > { %1025 = vmatprep.subr.bf16.mxu0 %v1010_v1 }
 0x1ac   : > { %1695 = vmatpush3.bf16.msra.mxu1 %v1829_v8 }
 0x1ad   : > { %1696 = vmatprep.subr.bf16.mxu1 %v1830_v59 }
 0x1ae   : > { %1026 = vmatpush1.bf16.msra.mxu0 %v1009_v48 }
 0x1af   : > { %1027 = vmatprep.subr.bf16.mxu0 %v1012_v4 }
 0x1b0   : > { %1697 = vmatpush3.bf16.msra.mxu1 %v1831_v9 }
 0x1b1   : > { %1698 = vmatprep.subr.bf16.mxu1 %v1832_v7 }
 0x1b2   : > { %1028 = vmatpush1.bf16.msra.mxu0 %v1011_v18 }
 0x1b3   : > { %1029 = vmatprep.subr.bf16.mxu0 %v1014_v5 }
 0x1b4   : > { %1699 = vmatpush3.bf16.msra.mxu1 %v1833_v21 }
 0x1b5   : > { %1700 = vmatprep.subr.bf16.mxu1 %v1834_v34 }
 0x1b6   : > { %1030 = vmatpush1.bf16.msra.mxu0 %v1013_v19 }
 0x1b7   : > { %1031 = vmatprep.subr.bf16.mxu0 %v1016_v10 }
 0x1b8   : > { %1701 = vmatpush3.bf16.msra.mxu1 %v1835_v39 }
 0x1b9   : > { %1702 = vmatprep.subr.bf16.mxu1 %v1836_v40 }
 0x1ba   : > { %1032 = vmatpush1.bf16.msra.mxu0 %v1015_v23 }
 0x1bc   : > { %1703 = vmatpush3.bf16.msra.mxu1 %v1837_v20 }
 0x1bd   : > { %1050 = vmatmul.mubr.bf16.vlgmr.msra.gmra.mrb[0].mxu0 %v993_v6 }
 0x1be   : > { %1059 = vmatprep.mubr.bf16.mxu0 %v1869_v62 }
 0x1c5   : > { %1060 = vmatmul.mubr.bf16.gmra.mrb[4].mxu0 %v994_v35 }
 0x1c6   : > { %1069 = vmatprep.mubr.bf16.mxu0 %v1869_v62 }
 0x1cd   : > { %1070 = vmatmul.mubr.bf16.gmra.mrb[8].mxu0 %v995_v47 }
 0x1ce   : > { %1079 = vmatprep.mubr.bf16.mxu0 %v1869_v62 }
 0x1d5   : > { %1080 = vmatmul.mubr.bf16.gmra.mrb[12].mxu0 %v996_v37 }
 0x1d6   : > { %1089 = vmatprep.mubr.bf16.mxu0 %v1869_v62 }
 0x1dd   : > { %1090 = vmatmul.mubr.bf16.gmra.mrb[16].mxu0 %v997_v11 }
 0x1de   : > { %1099 = vmatprep.mubr.bf16.mxu0 %v1869_v62 }
 0x1e5   : > { %1100 = vmatmul.mubr.bf16.gmra.mrb[20].mxu0 %v998_v25 }
 0x1e6   : > { %1109 = vmatprep.mubr.bf16.mxu0 %v1869_v62 }
 0x1ed   : > { %1110 = vmatmul.mubr.bf16.gmra.mrb[24].mxu0 %v999_v16 }
 0x1ee   : > { %1119 = vmatprep.mubr.bf16.mxu0 %v1869_v62 }
 0x1f5   : > { %1120 = vmatmul.mubr.bf16.gmra.mrb[28].mxu0 %v1000_v26 }
 0x290   : > { %v1051_v12 = vpop.f32.mrb[0].mxu0 }
 0x291   : > { %v1053_v27 = vpop.f32.mrb[1].mxu0 }
 0x292   : > { %v1055_v42 = vpop.f32.mrb[2].mxu0 }
 0x293   : > { %v1130_v57 = vpack.c.bf16 %v1055_v42, %v1051_v12  ;;  %v1057_v17 = vpop.f32.mrb[3].mxu0 }
 0x294   : > { %v1131_v29 = vpack.c.bf16 %v1057_v17, %v1053_v27 }
 0x296   : > { %1306 = vmatprep.mubr.bf16.mxu1 %v1131_v29 }
 0x297   : > { %1307 = vmatmul.mubr.bf16.vlgmr.msra.gmra.mrb[0].mxu1 %v1130_v57 }
 0x298   : > { %v1061_v60 = vpop.f32.mrb[4].mxu0 }
 0x299   : > { %v1063_v58 = vpop.f32.mrb[5].mxu0 }
 0x29a   : > { %v1065_v46 = vpop.f32.mrb[6].mxu0 }
 0x29b   : > { %v1132_v49 = vpack.c.bf16 %v1065_v46, %v1061_v60  ;;  %v1067_v31 = vpop.f32.mrb[7].mxu0 }
 0x29c   : > { %v1133_v50 = vpack.c.bf16 %v1067_v31, %v1063_v58 }
 0x29e   : > { %1314 = vmatprep.mubr.bf16.mxu1 %v1133_v50 }
 0x29f   : > { %1315 = vmatmul.mubr.bf16.gmra.mrb[4].mxu1 %v1132_v49 }
 0x2a0   : > { %v1071_v24 = vpop.f32.mrb[8].mxu0 }
 0x2a1   : > { %v1073_v41 = vpop.f32.mrb[9].mxu0 }
 0x2a2   : > { %v1075_v56 = vpop.f32.mrb[10].mxu0 }
 0x2a3   : > { %v1134_v32 = vpack.c.bf16 %v1075_v56, %v1071_v24  ;;  %v1077_v53 = vpop.f32.mrb[11].mxu0 }
 0x2a4   : > { %v1135_v54 = vpack.c.bf16 %v1077_v53, %v1073_v41 }
 0x2a6   : > { %1322 = vmatprep.mubr.bf16.mxu1 %v1135_v54 }
 0x2a7   : > { %1323 = vmatmul.mubr.bf16.gmra.mrb[8].mxu1 %v1134_v32 }
 0x2a8   : > { %v1081_v51 = vpop.f32.mrb[12].mxu0 }
 0x2a9   : > { %v1083_v55 = vpop.f32.mrb[13].mxu0 }
 0x2aa   : > { %v1085_v0 = vpop.f32.mrb[14].mxu0 }
 0x2ab   : > { %v1136_v61 = vpack.c.bf16 %v1085_v0, %v1081_v51  ;;  %v1087_v44 = vpop.f32.mrb[15].mxu0 }
 0x2ac   : > { %v1137_v22 = vpack.c.bf16 %v1087_v44, %v1083_v55 }
 0x2ae   : > { %1330 = vmatprep.mubr.bf16.mxu1 %v1137_v22 }
 0x2af   : > { %1331 = vmatmul.mubr.bf16.gmra.mrb[12].mxu1 %v1136_v61 }
 0x2b0   : > { %v1091_v28 = vpop.f32.mrb[16].mxu0 }
 0x2b1   : > { %v1093_v33 = vpop.f32.mrb[17].mxu0 }
 0x2b2   : > { %v1095_v62 = vpop.f32.mrb[18].mxu0 }
 0x2b3   : > { %v1138_v45 = vpack.c.bf16 %v1095_v62, %v1091_v28  ;;  %v1097_v13 = vpop.f32.mrb[19].mxu0 }
 0x2b4   : > { %v1139_v2 = vpack.c.bf16 %v1097_v13, %v1093_v33 }
 0x2b6   : > { %1338 = vmatprep.mubr.bf16.mxu1 %v1139_v2 }
 0x2b7   : > { %1339 = vmatmul.mubr.bf16.gmra.mrb[16].mxu1 %v1138_v45 }
 0x2b8   : > { %v1101_v36 = vpop.f32.mrb[20].mxu0 }
 0x2b9   : > { %v1103_v30 = vpop.f32.mrb[21].mxu0 }
 0x2ba   : > { %v1105_v14 = vpop.f32.mrb[22].mxu0 }
 0x2bb   : > { %v1140_v63 = vpack.c.bf16 %v1105_v14, %v1101_v36  ;;  %v1107_v1 = vpop.f32.mrb[23].mxu0 }
 0x2bc   : > { %v1141_v3 = vpack.c.bf16 %v1107_v1, %v1103_v30 }
 0x2be   : > { %1346 = vmatprep.mubr.bf16.mxu1 %v1141_v3 }
 0x2bf   : > { %1347 = vmatmul.mubr.bf16.gmra.mrb[20].mxu1 %v1140_v63 }
 0x2c0   : > { %v1111_v43 = vpop.f32.mrb[24].mxu0 }
 0x2c1   : > { %v1113_v15 = vpop.f32.mrb[25].mxu0 }
 0x2c2   : > { %v1115_v48 = vpop.f32.mrb[26].mxu0 }
 0x2c3   : > { %v1142_v4 = vpack.c.bf16 %v1115_v48, %v1111_v43  ;;  %v1117_v52 = vpop.f32.mrb[27].mxu0 }
 0x2c4   : > { %v1143_v38 = vpack.c.bf16 %v1117_v52, %v1113_v15 }
 0x2c6   : > { %1354 = vmatprep.mubr.bf16.mxu1 %v1143_v38 }
 0x2c7   : > { %1355 = vmatmul.mubr.bf16.gmra.mrb[24].mxu1 %v1142_v4 }
 0x2c8   : > { %v1121_v18 = vpop.f32.mrb[28].mxu0 }
 0x2c9   : > { %v1123_v5 = vpop.f32.mrb[29].mxu0 }
 0x2ca   : > { %v1125_v8 = vpop.f32.mrb[30].mxu0 }
 0x2cb   : > { %v1144_v59 = vpack.c.bf16 %v1125_v8, %v1121_v18  ;;  %v1127_v19 = vpop.f32.mrb[31].mxu0 }
 0x2cc   : > { %v1145_v9 = vpack.c.bf16 %v1127_v19, %v1123_v5 }
 0x2ce   : > { %1362 = vmatprep.mubr.bf16.mxu1 %v1145_v9 }
 0x2cf   : > { %1363 = vmatmul.mubr.bf16.gmra.mrb[28].mxu1 %v1144_v59 }
 0x36a   : > { %v1704_v10 = vpop.f32.mrb[0].mxu1 }
 0x36b   : > { %v1705_v7 = vpop.f32.mrb[1].mxu1 }
 0x36c   : > { %v1706_v23 = vadd.f32 %v1705_v7, %v1704_v10  ;;  %v1707_v21 = vpop.f32.mrb[2].mxu1 }
 0x36d   : > { %v1708_v34 = vpop.f32.mrb[3].mxu1 }
 0x36e   : > { %1372 = vst [vmem:[#allocation5] sm:$0xff] %v1706_v23  ;;  %v1709_v6 = vadd.f32 %v1708_v34, %v1707_v21  ;;  %v1413_v35 = vmul.f32 %v1706_v23, %v1706_v23 }
 0x370   : > { %1373 = vst [vmem:[#allocation5 + $0x8] sm:$0xff] %v1709_v6  ;;  %v1389_v47 = vadd.f32 %v1709_v6, %v1706_v23  ;;  %v1414_v37 = vmul.f32 %v1709_v6, %v1709_v6 }
 0x372   : > { %v1429_v11 = vadd.f32 %v1414_v37, %v1413_v35  ;;  %v1710_v25 = vpop.f32.mrb[4].mxu1 }
 0x373   : > { %v1711_v16 = vpop.f32.mrb[5].mxu1 }
 0x374   : > { %v1712_v26 = vadd.f32 %v1711_v16, %v1710_v25  ;;  %v1713_v39 = vpop.f32.mrb[6].mxu1 }
 0x375   : > { %v1714_v40 = vpop.f32.mrb[7].mxu1 }
 0x376   : > { %1374 = vst [vmem:[#allocation5 + $0x10] sm:$0xff] %v1712_v26  ;;  %v1390_v20 = vadd.f32 %v1712_v26, %v1389_v47  ;;  %v1415_v12 = vmul.f32 %v1712_v26, %v1712_v26  ;;  %v1715_v27 = vadd.f32 %v1714_v40, %v1713_v39 }
 0x378   : > { %v1430_v42 = vadd.f32 %v1429_v11, %v1415_v12  ;;  %1375 = vst [vmem:[#allocation5 + $0x18] sm:$0xff] %v1715_v27  ;;  %v1391_v57 = vadd.f32 %v1715_v27, %v1390_v20  ;;  %v1416_v17 = vmul.f32 %v1715_v27, %v1715_v27 }
 0x37a   : > { %v1431_v29 = vadd.f32 %v1430_v42, %v1416_v17  ;;  %v1716_v60 = vpop.f32.mrb[8].mxu1 }
 0x37b   : > { %v1717_v58 = vpop.f32.mrb[9].mxu1 }
 0x37c   : > { %v1718_v46 = vadd.f32 %v1717_v58, %v1716_v60  ;;  %v1719_v49 = vpop.f32.mrb[10].mxu1 }
 0x37d   : > { %v1720_v31 = vpop.f32.mrb[11].mxu1 }
 0x37e   : > { %1376 = vst [vmem:[#allocation5 + $0x20] sm:$0xff] %v1718_v46  ;;  %v1392_v50 = vadd.f32 %v1718_v46, %v1391_v57  ;;  %v1417_v24 = vmul.f32 %v1718_v46, %v1718_v46  ;;  %v1721_v41 = vadd.f32 %v1720_v31, %v1719_v49 }
 0x380   : > { %v1432_v56 = vadd.f32 %v1431_v29, %v1417_v24  ;;  %1377 = vst [vmem:[#allocation5 + $0x28] sm:$0xff] %v1721_v41  ;;  %v1393_v32 = vadd.f32 %v1721_v41, %v1392_v50  ;;  %v1418_v53 = vmul.f32 %v1721_v41, %v1721_v41 }
 0x382   : > { %v1433_v54 = vadd.f32 %v1432_v56, %v1418_v53  ;;  %v1722_v51 = vpop.f32.mrb[12].mxu1 }
 0x383   : > { %v1723_v55 = vpop.f32.mrb[13].mxu1 }
 0x384   : > { %v1724_v0 = vadd.f32 %v1723_v55, %v1722_v51  ;;  %v1725_v61 = vpop.f32.mrb[14].mxu1 }
 0x385   : > { %v1726_v44 = vpop.f32.mrb[15].mxu1 }
 0x386   : > { %1378 = vst [vmem:[#allocation5 + $0x30] sm:$0xff] %v1724_v0  ;;  %v1394_v22 = vadd.f32 %v1724_v0, %v1393_v32  ;;  %v1419_v28 = vmul.f32 %v1724_v0, %v1724_v0  ;;  %v1727_v33 = vadd.f32 %v1726_v44, %v1725_v61 }
 0x388   : > { %v1434_v62 = vadd.f32 %v1433_v54, %v1419_v28  ;;  %1379 = vst [vmem:[#allocation5 + $0x38] sm:$0xff] %v1727_v33  ;;  %v1395_v45 = vadd.f32 %v1727_v33, %v1394_v22  ;;  %v1420_v13 = vmul.f32 %v1727_v33, %v1727_v33  ;;  %v1388_v22 = vld [vmem:[#allocation8] sm:$0x1] }
 0x38a   : > { %v1435_v2 = vadd.f32 %v1434_v62, %v1420_v13  ;;  %v1728_v36 = vpop.f32.mrb[16].mxu1  ;;  %v1412_v62 = vld [vmem:[#allocation9] sm:$0x1] }
 0x38b   : > { %v1729_v30 = vpop.f32.mrb[17].mxu1 }
 0x38c   : > { %v1730_v14 = vadd.f32 %v1729_v30, %v1728_v36  ;;  %v1731_v63 = vpop.f32.mrb[18].mxu1 }
 0x38d   : > { %v1732_v1 = vpop.f32.mrb[19].mxu1 }
 0x38e   : > { %1380 = vst [vmem:[#allocation5 + $0x40] sm:$0xff] %v1730_v14  ;;  %v1396_v3 = vadd.f32 %v1730_v14, %v1395_v45  ;;  %v1421_v43 = vmul.f32 %v1730_v14, %v1730_v14  ;;  %v1733_v15 = vadd.f32 %v1732_v1, %v1731_v63 }
 0x390   : > { %v1436_v48 = vadd.f32 %v1435_v2, %v1421_v43  ;;  %1381 = vst [vmem:[#allocation5 + $0x48] sm:$0xff] %v1733_v15  ;;  %v1397_v4 = vadd.f32 %v1733_v15, %v1396_v3  ;;  %v1422_v52 = vmul.f32 %v1733_v15, %v1733_v15 }
 0x392   : > { %v1437_v38 = vadd.f32 %v1436_v48, %v1422_v52  ;;  %v1734_v18 = vpop.f32.mrb[20].mxu1 }
 0x393   : > { %v1735_v5 = vpop.f32.mrb[21].mxu1 }
 0x394   : > { %v1736_v8 = vadd.f32 %v1735_v5, %v1734_v18  ;;  %v1737_v59 = vpop.f32.mrb[22].mxu1 }
 0x395   : > { %v1738_v19 = vpop.f32.mrb[23].mxu1 }
 0x396   : > { %1382 = vst [vmem:[#allocation5 + $0x50] sm:$0xff] %v1736_v8  ;;  %v1398_v9 = vadd.f32 %v1736_v8, %v1397_v4  ;;  %v1423_v10 = vmul.f32 %v1736_v8, %v1736_v8  ;;  %v1739_v7 = vadd.f32 %v1738_v19, %v1737_v59 }
 0x398   : > { %v1438_v23 = vadd.f32 %v1437_v38, %v1423_v10  ;;  %1383 = vst [vmem:[#allocation5 + $0x58] sm:$0xff] %v1739_v7  ;;  %v1399_v21 = vadd.f32 %v1739_v7, %v1398_v9  ;;  %v1424_v34 = vmul.f32 %v1739_v7, %v1739_v7 }
 0x39a   : > { %v1439_v6 = vadd.f32 %v1438_v23, %v1424_v34  ;;  %v1740_v35 = vpop.f32.mrb[24].mxu1 }
 0x39b   : > { %v1741_v47 = vpop.f32.mrb[25].mxu1 }
 0x39c   : > { %v1742_v37 = vadd.f32 %v1741_v47, %v1740_v35  ;;  %v1743_v11 = vpop.f32.mrb[26].mxu1 }
 0x39d   : > { %v1744_v25 = vpop.f32.mrb[27].mxu1 }
 0x39e   : > { %1384 = vst [vmem:[#allocation5 + $0x60] sm:$0xff] %v1742_v37  ;;  %v1400_v16 = vadd.f32 %v1742_v37, %v1399_v21  ;;  %v1425_v26 = vmul.f32 %v1742_v37, %v1742_v37  ;;  %v1745_v39 = vadd.f32 %v1744_v25, %v1743_v11 }
 0x3a0   : > { %v1440_v40 = vadd.f32 %v1439_v6, %v1425_v26  ;;  %1385 = vst [vmem:[#allocation5 + $0x68] sm:$0xff] %v1745_v39  ;;  %v1401_v20 = vadd.f32 %v1745_v39, %v1400_v16  ;;  %v1426_v12 = vmul.f32 %v1745_v39, %v1745_v39 }
 0x3a2   : > { %v1441_v27 = vadd.f32 %v1440_v40, %v1426_v12  ;;  %v1746_v42 = vpop.f32.mrb[28].mxu1 }
 0x3a3   : > { %v1747_v57 = vpop.f32.mrb[29].mxu1 }
 0x3a4   : > { %v1748_v17 = vadd.f32 %v1747_v57, %v1746_v42  ;;  %v1749_v29 = vpop.f32.mrb[30].mxu1 }
 0x3a5   : > { %v1750_v60 = vpop.f32.mrb[31].mxu1 }
 0x3a6   : > { %1386 = vst [vmem:[#allocation5 + $0x70] sm:$0xff] %v1748_v17  ;;  %v1402_v58 = vadd.f32 %v1748_v17, %v1401_v20  ;;  %v1427_v46 = vmul.f32 %v1748_v17, %v1748_v17  ;;  %v1751_v49 = vadd.f32 %v1750_v60, %v1749_v29 }
 0x3a8   : > { %v1442_v31 = vadd.f32 %v1441_v27, %v1427_v46  ;;  %1387 = vst [vmem:[#allocation5 + $0x78] sm:$0xff] %v1751_v49  ;;  %v1403_v50 = vadd.f32 %v1751_v49, %v1402_v58  ;;  %v1428_v24 = vmul.f32 %v1751_v49, %v1751_v49 }
 0x3aa   : > { %v1404_v41 = vrot.slane %v1403_v50, 4  ;;  %v1443_v56 = vadd.f32 %v1442_v31, %v1428_v24 }
 0x3ac   : > { %v1405_v32 = vadd.f32 %v1404_v41, %v1403_v50  ;;  %v1444_v53 = vrot.slane %v1443_v56, 4 }
 0x3ae   : > { %v1406_v54 = vrot.slane %v1405_v32, 2  ;;  %v1445_v51 = vadd.f32 %v1444_v53, %v1443_v56 }
 0x3b0   : > { %v1407_v55 = vadd.f32 %v1406_v54, %v1405_v32  ;;  %v1446_v0 = vrot.slane %v1445_v51, 2 }
 0x3b2   : > { %v1408_v61 = vrot.slane %v1407_v55, 1  ;;  %v1447_v44 = vadd.f32 %v1446_v0, %v1445_v51 }
 0x3b4   : > { %v1409_v28 = vadd.f32 %v1408_v61, %v1407_v55  ;;  %v1448_v33 = vrot.slane %v1447_v44, 1 }
 0x3b6   : > { %v1410_v45 = vadd.f32 %v1409_v28, %v1388_v22  ;;  %v1449_v13 = vadd.f32 %v1448_v33, %v1447_v44 }
 0x3b8   : > { %1411 = vst [vmem:[#allocation8] sm:$0x1] %v1410_v45  ;;  %v1450_v2 = vadd.f32 %v1449_v13, %v1412_v62 }
 0x3ba   : > { %1451 = vst [vmem:[#allocation9] sm:$0x1] %v1450_v2 }
 0x3bb PF: > { %p1679_p8 = scmp.ne.s32.totalorder %s1856_s24, 3 }
 0x3bc   : > { %v1466_v48 = vld [vmem:[%s2383_s5] sm:$0x1] (!%p1679_p8)  ;;  %v1477_v59 = vld [vmem:[#allocation5 + $0x8] sm:$0xff] (!%p1679_p8)  ;;  %v1478_v19 = vld [vmem:[#allocation5 + $0x10] sm:$0xff] (!%p1679_p8) }
 0x3bd   : > { %1455 = sbr.rel (%p1679_p8) target bundleno = 1005 (0x3ed), region = 102  ;;  %v1471_v38 = vld [vmem:[%s2384_s6] sm:$0x1] (!%p1679_p8)  ;;  %v1479_v9 = vld [vmem:[#allocation5 + $0x18] sm:$0xff] (!%p1679_p8)  ;;  %v1481_v7 = vld [vmem:[#allocation5 + $0x28] sm:$0xff] (!%p1679_p8) }
 0x3be   : > { %v1476_v8 = vld [vmem:[#allocation5] sm:$0xff] (!%p1679_p8)  ;;  %v1482_v23 = vld [vmem:[#allocation5 + $0x30] sm:$0xff] (!%p1679_p8)  ;;  %v1483_v21 = vld [vmem:[#allocation5 + $0x38] sm:$0xff] (!%p1679_p8) }
 0x3bf   : > { %v1459_v36 = vld [vmem:[#allocation8] sm:$0x1] (!%p1679_p8)  ;;  %v1485_v6 = vld [vmem:[#allocation5 + $0x48] sm:$0xff] (!%p1679_p8)  ;;  %v1486_v35 = vld [vmem:[#allocation5 + $0x50] sm:$0xff] (!%p1679_p8) }
 0x3c0   : > { %v1460_v14 = vmul.f32 (!%p1679_p8), 0.025, %v1459_v36  ;;  %v1480_v10 = vld [vmem:[#allocation5 + $0x20] sm:$0xff] (!%p1679_p8)  ;;  %v1487_v37 = vld [vmem:[#allocation5 + $0x58] sm:$0xff] (!%p1679_p8)  ;;  %v1489_v40 = vld [vmem:[#allocation5 + $0x68] sm:$0xff] (!%p1679_p8) }
 0x3c1   : > { %v1461_v30 = vld [vmem:[#allocation9] sm:$0x1] (!%p1679_p8)  ;;  %v1490_v20 = vld [vmem:[#allocation5 + $0x70] sm:$0xff] (!%p1679_p8)  ;;  %v1491_v12 = vld [vmem:[#allocation5 + $0x78] sm:$0xff] (!%p1679_p8) }
 0x3c2   : > { %v1462_v63 = vmul.f32 (!%p1679_p8), 0.025, %v1461_v30  ;;  %v1463_v1 = vmul.f32 (!%p1679_p8), %v1460_v14, %v1460_v14  ;;  %v1484_v34 = vld [vmem:[#allocation5 + $0x40] sm:$0xff] (!%p1679_p8) }
 0x3c3   : > { %v1488_v11 = vld [vmem:[#allocation5 + $0x60] sm:$0xff] (!%p1679_p8) }
 0x3c4   : > { %v1464_v3 = vsub.f32 %v1462_v63, %v1463_v1 }
 0x3c6   : > { %v1465_v43 = vmax.f32 %v1464_v3, 0.0 }
 0x3c8   : > { %v1467_v15 = vadd.f32 1e-05, %v1465_v43 }
 0x3ca   : > { %1838 = vrsqrt.f32 %v1467_v15 }
 0x3d4   : > { %v1839_v4 = vpop.eup %1838 }
 0x3d5   : > { %v1469_v52 = vmul.f32 %v1839_v4, %v1466_v48 }
 0x3d7   : > { %1470 = vst [vmem:[#allocation8] sm:$0x1] %v1469_v52  ;;  %v1472_v18 = vmul.f32 %v1469_v52, %v1460_v14 }
 0x3d9   : > { %v1473_v5 = vsub.f32 %v1471_v38, %v1472_v18 }
 0x3db   : > { %1474 = vst [vmem:[#allocation9] sm:$0x1] %v1473_v5 }
 0x3de   : > { %v1680_v47 = vld [vmem:[#allocation8] ss:$0 sm:$0xff] }
 0x3df   : > { %v1499_v25 = vmul.f32 %v1680_v47, %v1476_v8  ;;  %v1500_v16 = vmul.f32 %v1680_v47, %v1477_v59  ;;  %v1501_v26 = vmul.f32 %v1680_v47, %v1478_v19  ;;  %v1502_v39 = vmul.f32 %v1680_v47, %v1479_v9 }
 0x3e0   : > { %v1503_v27 = vmul.f32 %v1680_v47, %v1480_v10  ;;  %v1504_v42 = vmul.f32 %v1680_v47, %v1481_v7  ;;  %v1505_v57 = vmul.f32 %v1680_v47, %v1482_v23  ;;  %v1506_v17 = vmul.f32 %v1680_v47, %v1483_v21 }
 0x3e1   : > { %v1507_v29 = vmul.f32 %v1680_v47, %v1484_v34  ;;  %v1508_v60 = vmul.f32 %v1680_v47, %v1485_v6  ;;  %v1509_v58 = vmul.f32 %v1680_v47, %v1486_v35  ;;  %v1510_v46 = vmul.f32 %v1680_v47, %v1487_v37 }
 0x3e2   : > { %v1681_v49 = vld [vmem:[#allocation9] ss:$0 sm:$0xff]  ;;  %v1511_v31 = vmul.f32 %v1680_v47, %v1488_v11  ;;  %v1512_v50 = vmul.f32 %v1680_v47, %v1489_v40  ;;  %v1513_v24 = vmul.f32 %v1680_v47, %v1490_v20  ;;  %v1514_v41 = vmul.f32 %v1680_v47, %v1491_v12 }
 0x3e3   : > { %v1522_v56 = vadd.f32 %v1681_v49, %v1499_v25  ;;  %v1523_v32 = vadd.f32 %v1681_v49, %v1500_v16  ;;  %v1524_v53 = vadd.f32 %v1681_v49, %v1501_v26  ;;  %v1525_v54 = vadd.f32 %v1681_v49, %v1502_v39 }
 0x3e4   : > { %v1526_v51 = vadd.f32 %v1681_v49, %v1503_v27  ;;  %v1527_v55 = vadd.f32 %v1681_v49, %v1504_v42  ;;  %v1528_v0 = vadd.f32 %v1681_v49, %v1505_v57  ;;  %v1529_v61 = vadd.f32 %v1681_v49, %v1506_v17 }
 0x3e5   : > { %1538 = vst [vmem:[%s2385_s7] sm:$0xff] %v1522_v56  ;;  %1539 = vst [vmem:[%s2385_s7 + $0x8] sm:$0xff] %v1523_v32  ;;  %v1530_v44 = vadd.f32 %v1681_v49, %v1507_v29  ;;  %v1531_v22 = vadd.f32 %v1681_v49, %v1508_v60  ;;  %v1532_v28 = vadd.f32 %v1681_v49, %v1509_v58 }
 0x3e6   : > { %1540 = vst [vmem:[%s2385_s7 + $0x10] sm:$0xff] %v1524_v53  ;;  %1541 = vst [vmem:[%s2385_s7 + $0x18] sm:$0xff] %v1525_v54  ;;  %v1533_v33 = vadd.f32 %v1681_v49, %v1510_v46  ;;  %v1534_v62 = vadd.f32 %v1681_v49, %v1511_v31  ;;  %v1535_v45 = vadd.f32 %v1681_v49, %v1512_v50 }
 0x3e7   : > { %1542 = vst [vmem:[%s2385_s7 + $0x20] sm:$0xff] %v1526_v51  ;;  %1543 = vst [vmem:[%s2385_s7 + $0x28] sm:$0xff] %v1527_v55  ;;  %v1536_v13 = vadd.f32 %v1681_v49, %v1513_v24  ;;  %v1537_v2 = vadd.f32 %v1681_v49, %v1514_v41 }
 0x3e8   : > { %1544 = vst [vmem:[%s2385_s7 + $0x30] sm:$0xff] %v1528_v0  ;;  %1545 = vst [vmem:[%s2385_s7 + $0x38] sm:$0xff] %v1529_v61 }
 0x3e9   : > { %1546 = vst [vmem:[%s2385_s7 + $0x40] sm:$0xff] %v1530_v44  ;;  %1547 = vst [vmem:[%s2385_s7 + $0x48] sm:$0xff] %v1531_v22 }
 0x3ea   : > { %1548 = vst [vmem:[%s2385_s7 + $0x50] sm:$0xff] %v1532_v28  ;;  %1549 = vst [vmem:[%s2385_s7 + $0x58] sm:$0xff] %v1533_v33 }
 0x3eb   : > { %1550 = vst [vmem:[%s2385_s7 + $0x60] sm:$0xff] %v1534_v62  ;;  %1551 = vst [vmem:[%s2385_s7 + $0x68] sm:$0xff] %v1535_v45 }
 0x3ec   : > { %1552 = vst [vmem:[%s2385_s7 + $0x70] sm:$0xff] %v1536_v13  ;;  %1553 = vst [vmem:[%s2385_s7 + $0x78] sm:$0xff] %v1537_v2 }
 0x3ed PF: > { %s17_s26 = sadd.s32 1, %s1864_s26   ;;  %s2388_s24 = smov %s1860_s25 }
 0x3ee   : > { %p14_p9 = scmp.ge.s32.totalorder %s17_s26, 6   ;;  %s2389_s25 = smov %s2391_s27 }
 0x3f0   :  { %16 = sbr.rel (!%p14_p9) target bundleno = 2 (0x2), region = 147 }
 0x3f7   :  { %1582 = vsyncmov [#allocation3] }
 0x3fa   :  { %s1583_s9 = vpop.sfrf %1582 }
 0x3fb   :  { %p1686_p10 = scmp.ne.s32.totalorder %s1583_s9, 0 }
 0x3fd   :  { %1587 = shalt.err (%p1686_p10)  }

</bundles_post_ra>
